<compile_context>
chip_gen: v6e
topology: v6e:2x2x1
jax: 0.10.0
libtpu: 0.0.40
codegen_flags: <defaults>
</compile_context>

<pallas_src>
import functools
from typing import NamedTuple

import jax
import jax.numpy as jnp
from jax.experimental import pallas as pl
from jax.experimental.pallas import tpu as pltpu


# ---------------------------------------------------------------------------
# Kernels
# ---------------------------------------------------------------------------

def _scg_folded_kernel(x_ref, w_ref, o_ref, *, approx_sigmoid):
    """out = x * sigmoid(x @ W_eff) with W_eff = W1^T @ W2^T folded offline (F x F)."""
    x = x_ref[...]                                                   # (tm, F), caller dtype
    logits = jnp.dot(x.astype(w_ref.dtype), w_ref[...],
                     preferred_element_type=jnp.float32)             # MXU, f32 accum
    gates = pl.reciprocal(1.0 + jnp.exp(-logits), approx=approx_sigmoid)   # EUP
    # Gating multiply against the original-precision x (PyTorch numerics).
    o_ref[...] = (x.astype(jnp.float32) * gates).astype(o_ref.dtype)


def _scg_two_matmul_kernel(x_ref, w1_ref, w2_ref, o_ref, *, approx_sigmoid):
    """out = x * sigmoid((x @ W1^T) @ W2^T) with both weights VMEM-resident."""
    x = x_ref[...]                                                   # (tm, F)
    g1 = jnp.dot(x.astype(w1_ref.dtype), w1_ref[...],
                 preferred_element_type=jnp.float32)                 # (tm, H)
    # TODO(synk): add_batch_norm=True branch (BatchNorm1d over the squeeze) not
    # implemented; the module default is add_batch_norm=False.
    g2 = jnp.dot(g1.astype(w2_ref.dtype), w2_ref[...],
                 preferred_element_type=jnp.float32)                 # (tm, F)
    gates = pl.reciprocal(1.0 + jnp.exp(-g2), approx=approx_sigmoid)
    o_ref[...] = (x.astype(jnp.float32) * gates).astype(o_ref.dtype)


# ---------------------------------------------------------------------------
# Hardware / tiling helpers
# ---------------------------------------------------------------------------

def _round_up(n, m):
    return ((n + m - 1) // m) * m


@functools.lru_cache(maxsize=1)
def _tpu_info():
    try:
        return pltpu.get_tpu_info()
    except Exception:
        return None


def _vmem_budget():
    """(scoped-VMEM budget bytes, is_small_vmem_generation)."""
    cap = 0
    info = _tpu_info()
    if info is not None:
        try:
            cap = int(getattr(info, "vmem_capacity_bytes", 0) or 0)
        except (TypeError, ValueError):
            cap = 0
    if cap <= 0:
        cap = 64 * 1024 * 1024          # unknown: assume smallest (v7x per-TC VMEM)
    return (cap * 3) // 4, cap <= 64 * 1024 * 1024


def _mxu_width():
    """MXU side length: 128 on v2-v5e, 256 on v6e/v7x (best effort)."""
    info = _tpu_info()
    if info is not None:
        for name in ("mxu_size", "mxu_contracting_size", "mxu_column_size"):
            v = getattr(info, name, None)
            if v:
                try:
                    return int(v)
                except (TypeError, ValueError):
                    pass
    try:
        kind = jax.devices()[0].device_kind.lower()
    except Exception:
        kind = ""
    if any(tag in kind for tag in ("v2", "v3", "v4", "v5")):
        return 128
    return 256


def _pick_tm(rows, F, x_bytes, out_bytes, mxu_in_bytes, weight_vmem_bytes,
             vmem_budget, small_vmem):
    """Largest MXU-aligned row tile that fits the VMEM budget with enough grid steps."""
    # Live VMEM per tile row (bytes):
    #   2 pipelined x buffers + 2 pipelined out buffers (BlockSpec double-buffering)
    #   + one MXU-dtype copy of x (in-kernel cast)
    #   + ~3 f32 temporaries (logits, gates, f32 x for the final multiply).
    per_row = F * (2 * x_bytes + 2 * out_bytes + mxu_in_bytes + 12)
    budget = max(vmem_budget - weight_vmem_bytes, 8 * per_row)
    tm_cap = budget // per_row
    # v7x (64 MiB physical per-TC VMEM): cap the tile at 512 (1024 buys <1% bandwidth)
    # and require >=8 steps so each of the 2 TensorCores gets >=4 pipelined iterations.
    candidates = (512, 256, 128) if small_vmem else (1024, 512, 256, 128)
    min_steps = 8 if small_vmem else 4
    for cand in candidates:
        if cand <= tm_cap and rows >= min_steps * cand:
            return cand
    # Small / medium problem: largest 8-aligned tile <= 128 not exceeding the row
    # count; the ragged last grid block is handled by masked partial writes.
    tm = int(min(128, tm_cap, max(rows, 8)))
    return max(8, (tm // 8) * 8)


# ---------------------------------------------------------------------------
# One-time parameter preparation (weight casts + optional offline fold)
# ---------------------------------------------------------------------------

class SCGParams(NamedTuple):
    weights: tuple
    folded: bool
    feature_size: int
    hidden_size: int
    approx_sigmoid: bool


def prepare_scg_params(w1_t, w2_t, *, compute_dtype=jnp.bfloat16,
                       fold_weights=None, approx_sigmoid=None):
    """w1_t: (F, H) = gating_weights_1.weight.T ; w2_t: (H, F) = gating_weights_2.weight.T."""
    F, H = w1_t.shape
    assert w2_t.shape == (H, F), f"w2_t shape {w2_t.shape} != {(H, F)}"
    # Lane-dense (tm, F) output tiles need F % 128 == 0 (avoid masked vst stores).
    assert F % 128 == 0, "feature_size must be a multiple of 128"

    cdt = jnp.dtype(compute_dtype if compute_dtype is not None else w1_t.dtype)
    if fold_weights is None:
        # Fold the two linears into one F x F matmul only when the folded pass is
        # not slower than the two MXU-width-padded passes, and the folded weight is
        # cheap to keep VMEM-resident.  MXU width: 128 on v5e, 256 on v6e/v7x.
        mxu = _mxu_width()
        fold_weights = (F <= 2 * _round_up(H, mxu)) and (F * F * cdt.itemsize <= 8 * 1024 * 1024)
    if approx_sigmoid is None:
        # EUP approximate reciprocal on the bf16 fast path; exact divide for f32 compute.
        approx_sigmoid = cdt != jnp.dtype(jnp.float32)

    if fold_weights:
        # No batch-norm / nonlinearity between the two linears -> folding is exact
        # (up to dtype): (x @ W1^T) @ W2^T == x @ (W1^T @ W2^T).
        w_eff = jnp.dot(w1_t.astype(jnp.float32), w2_t.astype(jnp.float32),
                        precision="highest").astype(cdt)
        weights = (w_eff,)
    else:
        weights = (w1_t.astype(cdt), w2_t.astype(cdt))
    # Materialize now so per-forward calls never re-pay the fold / casts.
    weights = tuple(jax.block_until_ready(w) for w in weights)

    return SCGParams(weights=weights, folded=bool(fold_weights),
                     feature_size=int(F), hidden_size=int(H),
                     approx_sigmoid=bool(approx_sigmoid))


# ---------------------------------------------------------------------------
# Forward wrapper
# ---------------------------------------------------------------------------

_SINGLE_BUFFERED_WEIGHTS_OK = None   # lazily probed: does this JAX accept pl.Buffered(1)?


def _pallas_forward(kernel, x2d, weights, tm, F, H, folded, single_buffer_weights,
                    vmem_budget, cost, out_dtype):
    rows = x2d.shape[0]
    grid = (pl.cdiv(rows, tm),)                       # ragged last block is masked

    x_spec = pl.BlockSpec((tm, F), lambda i: (i, 0))
    out_spec = pl.BlockSpec((tm, F), lambda i: (i, 0))
    # Constant index_map: each weight is DMA'd from HBM once and stays resident.
    wkw = {"pipeline_mode": pl.Buffered(1)} if single_buffer_weights else {}
    if folded:
        w_specs = [pl.BlockSpec((F, F), lambda i: (0, 0), **wkw)]
    else:
        w_specs = [pl.BlockSpec((F, H), lambda i: (0, 0), **wkw),
                   pl.BlockSpec((H, F), lambda i: (0, 0), **wkw)]

    return pl.pallas_call(
        kernel,
        out_shape=jax.ShapeDtypeStruct((rows, F), out_dtype),
        grid_spec=pltpu.PrefetchScalarGridSpec(
            num_scalar_prefetch=0,
            grid=grid,
            in_specs=[x_spec] + w_specs,
            out_specs=out_spec),
        compiler_params=pltpu.CompilerParams(
            dimension_semantics=("parallel",),
            vmem_limit_bytes=int(vmem_budget)),
        cost_estimate=cost,
    )(x2d, *weights)


def squeeze_context_gating(x, params, *, tm=None, out_dtype=None):
    """out = x * sigmoid((x @ W1^T) @ W2^T);  x: (..., F) in its native dtype."""
    global _SINGLE_BUFFERED_WEIGHTS_OK

    F, H = params.feature_size, params.hidden_size
    assert x.shape[-1] == F, f"last dim {x.shape[-1]} != feature_size {F}"
    orig_shape = x.shape
    x2d = x.reshape(-1, F)
    rows = x2d.shape[0]

    out_dtype = jnp.dtype(out_dtype) if out_dtype is not None else x.dtype
    x_bytes = jnp.dtype(x.dtype).itemsize
    out_bytes = jnp.dtype(out_dtype).itemsize
    w_elt = jnp.dtype(params.weights[0].dtype).itemsize
    weight_bytes = (F * F * w_elt) if params.folded else (2 * F * H * w_elt)

    vmem_budget, small_vmem = _vmem_budget()
    if tm is None:
        # Weights are (attempted) single-buffered (pl.Buffered(1)) -> count them once.
        tm = _pick_tm(rows, F, x_bytes, out_bytes, w_elt, weight_bytes,
                      vmem_budget, small_vmem)
    tm = max(8, (int(tm) // 8) * 8)

    # Advisory cost so XLA schedules the custom call sensibly in a larger graph.
    mm_flops = 2 * rows * F * (F if params.folded else 2 * H)
    cost = pl.CostEstimate(
        flops=int(mm_flops),
        transcendentals=int(rows * F),                                # sigmoid
        bytes_accessed=int(rows * F * (x_bytes + out_bytes) + weight_bytes),
    )

    base_kernel = _scg_folded_kernel if params.folded else _scg_two_matmul_kernel
    kernel = functools.partial(base_kernel, approx_sigmoid=params.approx_sigmoid)

    def run(single_buffer_weights):
        return _pallas_forward(kernel, x2d, params.weights, tm, F, H, params.folded,
                               single_buffer_weights, vmem_budget, cost, out_dtype)

    if _SINGLE_BUFFERED_WEIGHTS_OK is None:
        # One-time probe: prefer single-buffered weights, fall back if unsupported.
        try:
            out = jax.block_until_ready(run(True))
            _SINGLE_BUFFERED_WEIGHTS_OK = True
            return out.reshape(orig_shape)
        except Exception:
            _SINGLE_BUFFERED_WEIGHTS_OK = False
    out = run(_SINGLE_BUFFERED_WEIGHTS_OK)
    return out.reshape(orig_shape)


def squeeze_context_gating_ref(x, w1_t, w2_t):
    gates = jax.nn.sigmoid(
        jnp.dot(jnp.dot(x, w1_t, precision="highest"), w2_t, precision="highest"))
    return x * gates


# ---------------------------------------------------------------------------
# Demo / self-test
# ---------------------------------------------------------------------------

if __name__ == "__main__":
    # Small shapes consistent with the module: batch=4, seq=64, feature_size=256,
    # reduction_ratio=8 -> hidden H=32.  F is a multiple of 128 (lane-dense output).
    B, S, F, R = 4, 64, 256, 8
    H = F // R

    key = jax.random.PRNGKey(0)
    kx, k1, k2 = jax.random.split(key, 3)

    x = jax.random.normal(kx, (B, S, F), dtype=jnp.float32)
    # torch nn.Linear weights: W1 (H, F), W2 (F, H); kernel takes (in, out) layout.
    w1 = jax.random.normal(k1, (H, F), dtype=jnp.float32) * (1.0 / F ** 0.5)
    w2 = jax.random.normal(k2, (F, H), dtype=jnp.float32) * (1.0 / H ** 0.5)
    w1_t, w2_t = w1.T, w2.T

    ref = squeeze_context_gating_ref(x.reshape(-1, F), w1_t, w2_t).reshape(x.shape)

    # 1) f32 compute, explicit two-matmul path (mirrors the torch structure).
    p_f32 = prepare_scg_params(w1_t, w2_t, compute_dtype=jnp.float32, fold_weights=False)
    out_f32 = squeeze_context_gating(x, p_f32)
    jax.block_until_ready(out_f32)
    assert out_f32.shape == x.shape and out_f32.dtype == x.dtype
    assert jnp.allclose(out_f32, ref, atol=5e-3, rtol=5e-3), "f32 path mismatch"

    # 2) default fast path: bf16 MXU weights + folded F x F weight (one-time prep);
    #    the gating multiply still uses the original-precision x.
    p_fast = prepare_scg_params(w1_t, w2_t)
    out_fast = squeeze_context_gating(x, p_fast)
    jax.block_until_ready(out_fast)
    assert out_fast.shape == x.shape and out_fast.dtype == x.dtype
    assert jnp.allclose(out_fast, ref, atol=1e-1, rtol=1e-1), "bf16 path mismatch"

    # 3) ragged row count: exercises the masked partial last grid block (no pad/slice).
    rows3 = 18
    x3 = jax.random.normal(jax.random.PRNGKey(1), (rows3, F), dtype=jnp.float32)
    out3 = squeeze_context_gating(x3, p_f32)
    jax.block_until_ready(out3)
    ref3 = squeeze_context_gating_ref(x3, w1_t, w2_t)
    assert out3.shape == (rows3, F)
    assert jnp.allclose(out3, ref3, atol=5e-3, rtol=5e-3), "ragged path mismatch"

    print("KERNEL_OK")
</pallas_src>

<mosaic_0001>
module attributes {stable_mosaic.version = 11 : i64} {
  func.func @_scg_two_matmul_kernel(%arg0: i32, %arg1: memref<128x256xf32, #tpu.memory_space<vmem>>, %arg2: memref<256x32xf32, #tpu.memory_space<vmem>>, %arg3: memref<32x256xf32, #tpu.memory_space<vmem>>, %arg4: memref<128x256xf32, #tpu.memory_space<vmem>>) attributes {dimension_semantics = [#tpu.dimension_semantics<parallel>], iteration_bounds = array<i64: 2>, scalar_prefetch = 0 : i64, scratch_operands = 0 : i64, tpu.core_type = #tpu.core_type<tc>, window_params = [{transform_indices = @transform_0, window_bounds = array<i64: 128, 256>}, {pipeline_mode = #tpu.pipeline_mode<synchronous>, transform_indices = @transform_1, window_bounds = array<i64: 256, 32>}, {pipeline_mode = #tpu.pipeline_mode<synchronous>, transform_indices = @transform_2, window_bounds = array<i64: 32, 256>}, {transform_indices = @transform_3, window_bounds = array<i64: 128, 256>}]} {
    %c0 = arith.constant 0 : index
    %c0_0 = arith.constant 0 : index
    %0 = vector.load %arg1[%c0, %c0_0] : memref<128x256xf32, #tpu.memory_space<vmem>>, vector<128x256xf32>
    %c0_1 = arith.constant 0 : index
    %c0_2 = arith.constant 0 : index
    %1 = vector.load %arg2[%c0_1, %c0_2] : memref<256x32xf32, #tpu.memory_space<vmem>>, vector<256x32xf32>
    %cst = arith.constant dense<0.000000e+00> : vector<128x32xf32>
    %2 = tpu.matmul %0, %1, %cst {dimension_numbers = #tpu.dot_dimension_numbers<[1], [0], [0], [1], [0, 0, 1, 1], [], []>} : vector<128x256xf32>, vector<256x32xf32>, vector<128x32xf32> -> vector<128x32xf32>
    %c0_3 = arith.constant 0 : index
    %c0_4 = arith.constant 0 : index
    %3 = vector.load %arg3[%c0_3, %c0_4] : memref<32x256xf32, #tpu.memory_space<vmem>>, vector<32x256xf32>
    %cst_5 = arith.constant dense<0.000000e+00> : vector<128x256xf32>
    %4 = tpu.matmul %2, %3, %cst_5 {dimension_numbers = #tpu.dot_dimension_numbers<[1], [0], [0], [1], [0, 0, 1, 1], [], []>} : vector<128x32xf32>, vector<32x256xf32>, vector<128x256xf32> -> vector<128x256xf32>
    %cst_6 = arith.constant 0.000000e+00 : f32
    %5 = vector.broadcast %cst_6 : f32 to vector<128x256xf32>
    %6 = arith.subf %5, %4 : vector<128x256xf32>
    %7 = math.exp %6 : vector<128x256xf32>
    %cst_7 = arith.constant 1.000000e+00 : f32
    %8 = vector.broadcast %cst_7 : f32 to vector<128x256xf32>
    %9 = arith.addf %8, %7 : vector<128x256xf32>
    %10 = tpu.reciprocal %9 : vector<128x256xf32> -> vector<128x256xf32>
    %11 = arith.mulf %0, %10 : vector<128x256xf32>
    %c0_8 = arith.constant 0 : index
    %c0_9 = arith.constant 0 : index
    %12 = vector.load %arg4[%c0_8, %c0_9] : memref<128x256xf32, #tpu.memory_space<vmem>>, vector<128x256xf32>
    tpu.vector_store %arg4[%c0_8, %c0_9], %11 {strides = array<i32>} : memref<128x256xf32, #tpu.memory_space<vmem>>, vector<128x256xf32>,
    return
  }
  func.func @transform_0(%arg0: i32) -> (i32, i32) {
    %c0_i32 = arith.constant 0 : i32
    %c0_i32_0 = arith.constant 0 : i32
    return %arg0, %c0_i32 : i32, i32
  }
  func.func @transform_1(%arg0: i32) -> (i32, i32) {
    %c0_i32 = arith.constant 0 : i32
    %c0_i32_0 = arith.constant 0 : i32
    %c0_i32_1 = arith.constant 0 : i32
    return %c0_i32, %c0_i32_0 : i32, i32
  }
  func.func @transform_2(%arg0: i32) -> (i32, i32) {
    %c0_i32 = arith.constant 0 : i32
    %c0_i32_0 = arith.constant 0 : i32
    %c0_i32_1 = arith.constant 0 : i32
    return %c0_i32, %c0_i32_0 : i32, i32
  }
  func.func @transform_3(%arg0: i32) -> (i32, i32) {
    %c0_i32 = arith.constant 0 : i32
    %c0_i32_0 = arith.constant 0 : i32
    return %arg0, %c0_i32 : i32, i32
  }
}

module attributes {stable_mosaic.version = 11 : i64} {
  func.func @_scg_two_matmul_kernel(%arg0: i32, %arg1: memref<128x256xf32, #tpu.memory_space<vmem>>, %arg2: memref<256x32xf32, #tpu.memory_space<vmem>>, %arg3: memref<32x256xf32, #tpu.memory_space<vmem>>, %arg4: memref<128x256xf32, #tpu.memory_space<vmem>>) attributes {dimension_semantics = [#tpu.dimension_semantics<parallel>], iteration_bounds = array<i64: 2>, scalar_prefetch = 0 : i64, scratch_operands = 0 : i64, tpu.core_type = #tpu.core_type<tc>, window_params = [{transform_indices = @transform_0, window_bounds = array<i64: 128, 256>}, {pipeline_mode = #tpu.pipeline_mode<synchronous>, transform_indices = @transform_1, window_bounds = array<i64: 256, 32>}, {pipeline_mode = #tpu.pipeline_mode<synchronous>, transform_indices = @transform_2, window_bounds = array<i64: 32, 256>}, {transform_indices = @transform_3, window_bounds = array<i64: 128, 256>}]} {
    %c0 = arith.constant 0 : index
    %c0_0 = arith.constant 0 : index
    %0 = vector.load %arg1[%c0, %c0_0] : memref<128x256xf32, #tpu.memory_space<vmem>>, vector<128x256xf32>
    %c0_1 = arith.constant 0 : index
    %c0_2 = arith.constant 0 : index
    %1 = vector.load %arg2[%c0_1, %c0_2] : memref<256x32xf32, #tpu.memory_space<vmem>>, vector<256x32xf32>
    %cst = arith.constant dense<0.000000e+00> : vector<128x32xf32>
    %2 = tpu.matmul %0, %1, %cst {dimension_numbers = #tpu.dot_dimension_numbers<[1], [0], [0], [1], [0, 0, 1, 1], [], []>} : vector<128x256xf32>, vector<256x32xf32>, vector<128x32xf32> -> vector<128x32xf32>
    %c0_3 = arith.constant 0 : index
    %c0_4 = arith.constant 0 : index
    %3 = vector.load %arg3[%c0_3, %c0_4] : memref<32x256xf32, #tpu.memory_space<vmem>>, vector<32x256xf32>
    %cst_5 = arith.constant dense<0.000000e+00> : vector<128x256xf32>
    %4 = tpu.matmul %2, %3, %cst_5 {dimension_numbers = #tpu.dot_dimension_numbers<[1], [0], [0], [1], [0, 0, 1, 1], [], []>} : vector<128x32xf32>, vector<32x256xf32>, vector<128x256xf32> -> vector<128x256xf32>
    %cst_6 = arith.constant 0.000000e+00 : f32
    %5 = vector.broadcast %cst_6 : f32 to vector<128x256xf32>
    %6 = arith.subf %5, %4 : vector<128x256xf32>
    %7 = math.exp %6 : vector<128x256xf32>
    %cst_7 = arith.constant 1.000000e+00 : f32
    %8 = vector.broadcast %cst_7 : f32 to vector<128x256xf32>
    %9 = arith.addf %8, %7 : vector<128x256xf32>
    %10 = tpu.reciprocal %9 : vector<128x256xf32> -> vector<128x256xf32>
    %11 = arith.mulf %0, %10 : vector<128x256xf32>
    %c0_8 = arith.constant 0 : index
    %c0_9 = arith.constant 0 : index
    %12 = vector.load %arg4[%c0_8, %c0_9] : memref<128x256xf32, #tpu.memory_space<vmem>>, vector<128x256xf32>
    tpu.vector_store %arg4[%c0_8, %c0_9], %11 {strides = array<i32>} : memref<128x256xf32, #tpu.memory_space<vmem>>, vector<128x256xf32>,
    return
  }
  func.func @transform_0(%arg0: i32) -> (i32, i32) {
    %c0_i32 = arith.constant 0 : i32
    %c0_i32_0 = arith.constant 0 : i32
    return %arg0, %c0_i32 : i32, i32
  }
  func.func @transform_1(%arg0: i32) -> (i32, i32) {
    %c0_i32 = arith.constant 0 : i32
    %c0_i32_0 = arith.constant 0 : i32
    %c0_i32_1 = arith.constant 0 : i32
    return %c0_i32, %c0_i32_0 : i32, i32
  }
  func.func @transform_2(%arg0: i32) -> (i32, i32) {
    %c0_i32 = arith.constant 0 : i32
    %c0_i32_0 = arith.constant 0 : i32
    %c0_i32_1 = arith.constant 0 : i32
    return %c0_i32, %c0_i32_0 : i32, i32
  }
  func.func @transform_3(%arg0: i32) -> (i32, i32) {
    %c0_i32 = arith.constant 0 : i32
    %c0_i32_0 = arith.constant 0 : i32
    return %arg0, %c0_i32 : i32, i32
  }
}

</mosaic_0001>

<bundles_post_ra>
// kernel: tpu_custom_call.1
= control target key start
LH: loop header
LB: loop body
LE: loop exit
PB: predicated region body
PF: predicated region fallthrough
CT: control target
= control target key end

     0   :  { %8 = vsyncpa [#allocation3], 0  ;;  %s1854_s0 = inlined_call_operand.hbm [shape: f32[256,256], index: 0, kind: input, shape index: {}]   ;;  %s1855_s1 = inlined_call_operand.vmem [shape: f32[256,32], index: 1, kind: input, shape index: {}]   ;;  %s1856_s2 = inlined_call_operand.vmem [shape: f32[32,256], index: 2, kind: input, shape index: {}]   ;;  %s1857_s3 = inlined_call_operand.hbm [shape: f32[256,256], index: 3, kind: output, shape index: {}]  }
   0x1   :  { %10 = vsyncpa [#allocation3 + $0x1], 0 }
   0x2   :  { %11 = vsyncpa [#allocation4], 0 }
   0x3   :  { %13 = vsyncpa [#allocation4 + $0x1], 0  ;;  %s1347_s12 = smov 0   ;;  %s1349_s13 = smov 0  }
   0x4   :  { %s1351_s14 = smov 0   ;;  %s1353_s15 = smov 0  }
   0x5 LB: > { %s1368_s16 = sadd.s32 4294967295, %s1318_s15   ;;  %s931_s17 = sadd.s32 4294967294, %s1318_s15   ;;  %s1318_s15 = sphi %s1353_s15, %s1872_s15   ;;  %s1314_s14 = sphi %s1351_s14, %s1871_s14   ;;  %s1310_s13 = sphi %s1349_s13, %s1870_s13   ;;  %s1306_s12 = sphi %s1347_s12, %s1869_s12  }
   0x6   : > { %s1372_s18 = sadd.s32 1, %s1318_s15   ;;  %s26_s19 = sadd.s32 1, %s1314_s14 }
   0x7   : > { %s23_s20 = ssub.s32 %s1318_s15, %s1372_s18  ;;  %p33_p0 = scmp.ne.s32.totalorder %s1314_s14, %s1310_s13 }
   0x8   : > { %p24_p1 = scmp.eq.s32.totalorder %s23_s20, 0  ;;  %p34_p2 = scmp.eq.s32.totalorder %s1318_s15, 0 }
   0x9   : > { %p39_p3 = scmp.ne.s32.totalorder %s1310_s13, %s1306_s12  ;;  %p40_p4 = scmp.eq.s32.totalorder %s1368_s16, 0 }
   0xa   : > { %s1384_s21 = scalar_select %p24_p1, %s1314_s14, %s26_s19  }
   0xb   : > { %p1386_p5 = por %p34_p2, %p33_p0  ;;  %p1390_p6 = por %p40_p4, %p39_p3 }
   0xc   : > { %p105_p7 = scmp.eq.s32.totalorder %s1368_s16, 1  ;;  %p111_p8 = scmp.eq.s32.totalorder %s931_s17, 1 }
   0xd   : > { %s1861_s23 = scalar_select %p1390_p6, 1, 0 }
   0xe   : > { %p1059_p10 = scmp.lt.s32.totalorder %s1318_s15, 2  ;;  %p1397_p11 = por %p105_p7, %p33_p0 }
   0xf   : > { %p1401_p12 = por %p111_p8, %p39_p3  ;;  %s137_s26 = sand.u32 1, %s1314_s14  }
  0x10   : > { %s1862_s24 = scalar_select %p1397_p11, 1, 0 }
  0x11   : > { %s1863_s25 = scalar_select %p1401_p12, 1, 0 }
  0x12   : > { %s964_s27 = sshll.u32 %s1318_s15, 12  ;;  %s934_s28 = sshll.u32 %s137_s26, 8 }
  0x13   : > { %s1410_s4 = scalar_lea.hbm %s1854_s0, %s964_s27  ;;  %s141_s5 = scalar_lea.vmem [#allocation2], %s934_s28 }
  0x14   : > { %s149_s6 = sshll.u32 %s141_s5, 4  ;;  %p1414_p13 = pnand %p1059_p10, %p1386_p5  ;;  %s1418_s6 = int_to_ptr.vmem [resolvable:$true] %s149_s6 }
  0x15   : > { %s1420_s8 = scalar_lea.sflag [#allocation3], %s137_s26  ;;  %s1226_s9 = scalar_lea.hbm %s1410_s4, 4096 }
  0x16   : > { %p1227_p0 = scmp.ne.s32.totalorder %s1410_s4, %s1226_s9  ;;  %p1228_p1 = pneg %p1414_p13 }
  0x17   : > { %s1231_s17 = scalar_lea.hbm %s1854_s0, 8192  ;;  %p1232_p4 = scmp.lt.s32.totalorder %s1410_s4, %s1854_s0 }
  0x18   : > { %p1229_p2 = pnand %p1228_p1, %p1227_p0  ;;  %p1233_p5 = scmp.lt.s32.totalorder %s1231_s17, %s1226_s9 }
  0x1a   : > { %p1230_p3 = pneg %p1229_p2  ;;  %p1234_p7 = por %p1233_p5, %p1232_p4 }
  0x1c   : > { %p1235_p8 = pnand %p1234_p7, %p1230_p3 }
  0x1e   : > { %1238 = shalt.err (!%p1235_p8)
}
  0x1f   : > { %s1239_s22 = scalar_lea.vmem %s1418_s6, 4096  ;;  %s1320_s26 = smov [#allocation2]  }
  0x20   : > { %p1240_p10 = scmp.ne.s32.totalorder %s1418_s6, %s1239_s22  ;;  %s1244_s27 = sshll.u32 %s1320_s26, 4  ;;  %s1245_s27 = int_to_ptr.vmem [resolvable:$false] %s1244_s27 }
  0x21   : > { %s1246_s28 = scalar_lea.vmem %s1245_s27, 8192  ;;  %p1247_p2 = scmp.lt.s32.totalorder %s1418_s6, %s1245_s27 }
  0x22   : > { %p1242_p9 = pnand %p1240_p10, %p1228_p1  ;;  %p1248_p12 = scmp.lt.s32.totalorder %s1246_s28, %s1239_s22 }
  0x24   : > { %p1243_p0 = pneg %p1242_p9  ;;  %p1249_p11 = por %p1248_p12, %p1247_p2 }
  0x26   : > { %p1250_p6 = pnand %p1249_p11, %p1243_p0 }
  0x28   : > { %1253 = shalt.err (!%p1250_p6)
}
  0x29   : > { %s1321_s29 = smov 256   ;;  %s1322_s30 = smov 16  }
  0x2a   : > { %1054 = dma.hbm_to_vmem [thread:$0]  (!%p1414_p13), %s1410_s4, 4096, %s1418_s6, %s1420_s8, %s1321_s29, %s1321_s29, %s1322_s30  }
  0x2b   : > { %p938_p9 = scmp.ge.s32.totalorder %s1318_s15, 1  ;;  %p157_p1 = scmp.lt.s32.totalorder %s1318_s15, 3 }
  0x2d   : > { %p158_p3 = pnand %p938_p9, %p157_p1 }
  0x2e   : > { %s1444_s5 = sand.u32 (!%p158_p3), 1, %s1310_s13   ;;  %p1865_p6 = scmp.ne.s32.totalorder (!%p158_p3), %s1861_s23, 0 }
  0x2f   : > { %161 = sbr.rel (%p158_p3) target bundleno = 589 (0x24d), region = 32  ;;  %s939_s9 = sshll.u32 (!%p158_p3), %s1444_s5, 8 }
  0x30   : > { %s164_s10 = scalar_lea.sflag (!%p158_p3), [#allocation3], %s1444_s5  ;;  %s1450_s11 = scalar_lea.vmem (!%p158_p3), [#allocation2], %s939_s9 }
  0x34   : > { %1297 = dma.done.wait (%p1865_p6), %s164_s10, 4096  }
  0x35   : > { %1299 = vsyncadd (%p1865_p6), %s164_s10, 4294963200  ;;  %v255_v0 = vld [vmem:[%s1855_s1 + $0xf8] sm:$0xff]  ;;  %v254_v2 = vld [vmem:[%s1855_s1 + $0xf0] sm:$0xff]  ;;  %vm409_vm0 = vcmask 261120   ;;  %s1739_s17 = scalar_lea.vmem [#allocation5], %s939_s9  ;;  %s966_s9 = sshll.u32 %s1368_s16, 12 }
  0x36   : > { %v239_v1 = vld [vmem:[%s1855_s1 + $0x78] sm:$0xff]  ;;  %967 = vmatprep.subr.mxu0 %v255_v0  ;;  %v238_v3 = vld [vmem:[%s1855_s1 + $0x70] sm:$0xff]  ;;  %v253_v4 = vld [vmem:[%s1855_s1 + $0xe8] sm:$0xff]  ;;  %s858_s19 = sshll.u32 %s1739_s17, 4  ;;  %s1806_s23 = scalar_lea.hbm %s1857_s3, %s966_s9  ;;  %s1808_s19 = int_to_ptr.vmem [resolvable:$true] %s858_s19 }
  0x37   : > { %968 = vmatpush3.msra.mxu0 %v239_v1  ;;  %v237_v5 = vld [vmem:[%s1855_s1 + $0x68] sm:$0xff]  ;;  %v252_v6 = vld [vmem:[%s1855_s1 + $0xe0] sm:$0xff]  ;;  %v251_v8 = vld [vmem:[%s1855_s1 + $0xd8] sm:$0xff]  ;;  %s844_s16 = scalar_lea.sflag [#allocation4], %s1444_s5  ;;  %s1254_s26 = scalar_lea.vmem %s1808_s19, 4096 }
  0x38   : > { %969 = vmatprep.subr.mxu0 %v254_v2  ;;  %v236_v7 = vld [vmem:[%s1855_s1 + $0x60] sm:$0xff]  ;;  %v235_v9 = vld [vmem:[%s1855_s1 + $0x58] sm:$0xff]  ;;  %v250_v10 = vld [vmem:[%s1855_s1 + $0xd0] sm:$0xff]  ;;  %p1255_p11 = scmp.ne.s32.totalorder %s1808_s19, %s1254_s26  ;;  %p1866_p12 = scmp.ne.s32.totalorder %s1862_s24, 0 }
  0x39   : > { %970 = vmatpush3.msra.mxu0 %v238_v3  ;;  %v234_v11 = vld [vmem:[%s1855_s1 + $0x50] sm:$0xff]  ;;  %v249_v12 = vld [vmem:[%s1855_s1 + $0xc8] sm:$0xff]  ;;  %v248_v15 = vld [vmem:[%s1855_s1 + $0xc0] sm:$0xff]  ;;  %s1324_s27 = smov [#allocation5]  }
  0x3a   : > { %971 = vmatprep.subr.mxu0 %v253_v4  ;;  %v1496_v13 = vld [vmem:[%s1450_s11 + $0x8] sm:$0xff]  ;;  %v232_v16 = vld [vmem:[%s1855_s1 + $0x40] sm:$0xff]  ;;  %v247_v17 = vld [vmem:[%s1855_s1 + $0xb8] sm:$0xff]  ;;  %p1256_p13 = pnand %p1255_p11, %p1866_p12  ;;  %s1258_s28 = sshll.u32 %s1324_s27, 4  ;;  %s1259_s28 = int_to_ptr.vmem [resolvable:$false] %s1258_s28 }
  0x3b   : > { %972 = vmatpush3.msra.mxu0 %v237_v5  ;;  %v233_v14 = vld [vmem:[%s1855_s1 + $0x48] sm:$0xff]  ;;  %320 = vmatprep.mubr.f32.mxu0 %v1496_v13  ;;  %v231_v18 = vld [vmem:[%s1855_s1 + $0x38] sm:$0xff]  ;;  %v246_v19 = vld [vmem:[%s1855_s1 + $0xb0] sm:$0xff]  ;;  %s1260_s29 = scalar_lea.vmem %s1259_s28, 8192  ;;  %p1261_p5 = scmp.lt.s32.totalorder %s1808_s19, %s1259_s28 }
  0x3c   : > { %973 = vmatprep.subr.mxu0 %v252_v6  ;;  %v230_v20 = vld [vmem:[%s1855_s1 + $0x30] sm:$0xff]  ;;  %v245_v21 = vld [vmem:[%s1855_s1 + $0xa8] sm:$0xff]  ;;  %v244_v23 = vld [vmem:[%s1855_s1 + $0xa0] sm:$0xff]  ;;  %p1257_p4 = pneg %p1256_p13  ;;  %p1262_p7 = scmp.lt.s32.totalorder %s1260_s29, %s1254_s26 }
  0x3d   : > { %974 = vmatpush3.msra.mxu0 %v236_v7  ;;  %v229_v22 = vld [vmem:[%s1855_s1 + $0x28] sm:$0xff]  ;;  %v228_v24 = vld [vmem:[%s1855_s1 + $0x20] sm:$0xff]  ;;  %v408_v25 = vld [vmem:[%s1856_s2 + $0x38] sm:$0xff] }
  0x3e   : > { %975 = vmatprep.subr.mxu0 %v251_v8  ;;  %v407_v26 = vld [vmem:[%s1856_s2 + $0x30] sm:$0xff]  ;;  %v243_v27 = vld [vmem:[%s1855_s1 + $0x98] sm:$0xff]  ;;  %482 = vmatprep.subr.mxu1 %v408_v25  ;;  %v406_v28 = vld [vmem:[%s1856_s2 + $0x28] sm:$0xff]  ;;  %v1323_v8 = vmov 0.0   ;;  %p1263_p8 = por %p1262_p7, %p1261_p5 }
  0x3f   : > { %976 = vmatpush3.msra.mxu0 %v235_v9  ;;  %v227_v29 = vld [vmem:[%s1855_s1 + $0x18] sm:$0xff]  ;;  %483 = vmatpush1.msra.mxu1 %v407_v26  ;;  %v242_v30 = vld [vmem:[%s1855_s1 + $0x90] sm:$0xff]  ;;  %v241_v32 = vld [vmem:[%s1855_s1 + $0x88] sm:$0xff] }
  0x40   : > { %977 = vmatprep.subr.mxu0 %v250_v10  ;;  %484 = vmatprep.subr.mxu1 %v406_v28  ;;  %v226_v31 = vld [vmem:[%s1855_s1 + $0x10] sm:$0xff]  ;;  %v225_v33 = vld [vmem:[%s1855_s1 + $0x8] sm:$0xff]  ;;  %v240_v34 = vld [vmem:[%s1855_s1 + $0x80] sm:$0xff]  ;;  %p1264_p10 = pnand %p1263_p8, %p1257_p4 }
  0x41   : > { %978 = vmatpush3.msra.mxu0 %v234_v11  ;;  %v224_v35 = vld [vmem:[%s1855_s1] sm:$0xff]  ;;  %v1569_v37 = vld [vmem:[%s1450_s11 + $0x18] sm:$0xff]  ;;  %v1574_v38 = vld [vmem:[%s1450_s11 + $0x10] sm:$0xff]  ;;  %522 = vmatprep.mubr.f32.mxu1 %v1323_v8 }
  0x42   : > { %979 = vmatprep.subr.mxu0 %v249_v12  ;;  %v1566_v36 = vld [vmem:[%s1450_s11] sm:$0xff]  ;;  %v1577_v39 = vld [vmem:[%s1450_s11 + $0x28] sm:$0xff]  ;;  %v1585_v41 = vld [vmem:[%s1450_s11 + $0x38] sm:$0xff] }
  0x43   : > { %980 = vmatpush3.msra.mxu0 %v233_v14  ;;  %v1582_v40 = vld [vmem:[%s1450_s11 + $0x20] sm:$0xff]  ;;  %v1590_v42 = vld [vmem:[%s1450_s11 + $0x30] sm:$0xff]  ;;  %v1593_v43 = vld [vmem:[%s1450_s11 + $0x48] sm:$0xff] }
  0x44   : > { %981 = vmatprep.subr.mxu0 %v248_v15  ;;  %v1598_v44 = vld [vmem:[%s1450_s11 + $0x40] sm:$0xff]  ;;  %v1601_v45 = vld [vmem:[%s1450_s11 + $0x58] sm:$0xff]  ;;  %v1606_v46 = vld [vmem:[%s1450_s11 + $0x50] sm:$0xff] }
  0x45   : > { %982 = vmatpush3.msra.mxu0 %v232_v16  ;;  %v1609_v47 = vld [vmem:[%s1450_s11 + $0x68] sm:$0xff]  ;;  %v1614_v48 = vld [vmem:[%s1450_s11 + $0x60] sm:$0xff]  ;;  %v1617_v49 = vld [vmem:[%s1450_s11 + $0x78] sm:$0xff] }
  0x46   : > { %983 = vmatprep.subr.mxu0 %v247_v17  ;;  %v1622_v50 = vld [vmem:[%s1450_s11 + $0x70] sm:$0xff]  ;;  %v1625_v51 = vld [vmem:[%s1450_s11 + $0x88] sm:$0xff]  ;;  %v1630_v52 = vld [vmem:[%s1450_s11 + $0x80] sm:$0xff] }
  0x47   : > { %984 = vmatpush3.msra.mxu0 %v231_v18  ;;  %v1633_v53 = vld [vmem:[%s1450_s11 + $0x98] sm:$0xff]  ;;  %v1638_v54 = vld [vmem:[%s1450_s11 + $0x90] sm:$0xff]  ;;  %v1641_v55 = vld [vmem:[%s1450_s11 + $0xa8] sm:$0xff] }
  0x48   : > { %985 = vmatprep.subr.mxu0 %v246_v19  ;;  %v1646_v56 = vld [vmem:[%s1450_s11 + $0xa0] sm:$0xff]  ;;  %v1649_v57 = vld [vmem:[%s1450_s11 + $0xb8] sm:$0xff]  ;;  %v1654_v58 = vld [vmem:[%s1450_s11 + $0xb0] sm:$0xff] }
  0x49   : > { %986 = vmatpush3.msra.mxu0 %v230_v20  ;;  %v1657_v59 = vld [vmem:[%s1450_s11 + $0xc8] sm:$0xff]  ;;  %v1662_v60 = vld [vmem:[%s1450_s11 + $0xc0] sm:$0xff]  ;;  %v1665_v61 = vld [vmem:[%s1450_s11 + $0xd8] sm:$0xff] }
  0x4a   : > { %987 = vmatprep.subr.mxu0 %v245_v21  ;;  %v1670_v62 = vld [vmem:[%s1450_s11 + $0xd0] sm:$0xff]  ;;  %v1673_v63 = vld [vmem:[%s1450_s11 + $0xe8] sm:$0xff]  ;;  %v1678_v0 = vld [vmem:[%s1450_s11 + $0xe0] sm:$0xff] }
  0x4b   : > { %988 = vmatpush3.msra.mxu0 %v229_v22  ;;  %v1681_v1 = vld [vmem:[%s1450_s11 + $0xf8] sm:$0xff]  ;;  %v1686_v2 = vld [vmem:[%s1450_s11 + $0xf0] sm:$0xff]  ;;  %v405_v3 = vld [vmem:[%s1856_s2 + $0x20] sm:$0xff] }
  0x4c   : > { %989 = vmatprep.subr.mxu0 %v244_v23  ;;  %485 = vmatpush1.msra.mxu1 %v405_v3  ;;  %v404_v4 = vld [vmem:[%s1856_s2 + $0x18] sm:$0xff]  ;;  %v403_v5 = vld [vmem:[%s1856_s2 + $0x10] sm:$0xff]  ;;  %v402_v6 = vld [vmem:[%s1856_s2 + $0x8] sm:$0xff] }
  0x4d   : > { %990 = vmatpush3.msra.mxu0 %v228_v24  ;;  %486 = vmatprep.subr.mxu1 %v404_v4  ;;  %v401_v7 = vld [vmem:[%s1856_s2] sm:$0xff] }
  0x4e   : > { %991 = vmatprep.subr.mxu0 %v243_v27  ;;  %487 = vmatpush1.msra.mxu1 %v403_v5 }
  0x4f   : > { %992 = vmatpush3.msra.mxu0 %v227_v29  ;;  %488 = vmatprep.subr.mxu1 %v402_v6 }
  0x50   : > { %993 = vmatprep.subr.mxu0 %v242_v30  ;;  %489 = vmatpush1.msra.mxu1 %v401_v7 }
  0x51   : > { %994 = vmatpush3.msra.mxu0 %v226_v31 }
  0x52   : > { %995 = vmatprep.subr.mxu0 %v241_v32 }
  0x53   : > { %996 = vmatpush3.msra.mxu0 %v225_v33 }
  0x54   : > { %997 = vmatprep.subr.mxu0 %v240_v34 }
  0x55   : > { %998 = vmatpush3.msra.mxu0 %v224_v35 }
  0x56   : > { %321 = vmatmul.mubr.f32.vlgmr.msra.gmra.mxu0 %v1566_v36 }
  0x57   : > { %325 = vmatprep.mubr.f32.mxu0 %v1569_v37 }
  0x5a   : > { %326 = vmatmul.mubr.f32.gmra.mxu0 %v1574_v38 }
  0x5b   : > { %330 = vmatprep.mubr.f32.mxu0 %v1577_v39 }
  0x5e   : > { %331 = vmatmul.mubr.f32.gmra.mxu0 %v1582_v40 }
  0x5f   : > { %335 = vmatprep.mubr.f32.mxu0 %v1585_v41 }
  0x62   : > { %336 = vmatmul.mubr.f32.gmra.mxu0 %v1590_v42 }
  0x63   : > { %340 = vmatprep.mubr.f32.mxu0 %v1593_v43 }
  0x66   : > { %341 = vmatmul.mubr.f32.gmra.mxu0 %v1598_v44 }
  0x67   : > { %345 = vmatprep.mubr.f32.mxu0 %v1601_v45 }
  0x6a   : > { %346 = vmatmul.mubr.f32.gmra.mxu0 %v1606_v46 }
  0x6b   : > { %350 = vmatprep.mubr.f32.mxu0 %v1609_v47 }
  0x6e   : > { %351 = vmatmul.mubr.f32.gmra.mxu0 %v1614_v48 }
  0x6f   : > { %355 = vmatprep.mubr.f32.mxu0 %v1617_v49 }
  0x72   : > { %356 = vmatmul.mubr.f32.gmra.mxu0 %v1622_v50 }
  0x73   : > { %360 = vmatprep.mubr.f32.mxu0 %v1625_v51 }
  0x76   : > { %361 = vmatmul.mubr.f32.gmra.mxu0 %v1630_v52 }
  0x77   : > { %365 = vmatprep.mubr.f32.mxu0 %v1633_v53 }
  0x7a   : > { %366 = vmatmul.mubr.f32.gmra.mxu0 %v1638_v54 }
  0x7b   : > { %370 = vmatprep.mubr.f32.mxu0 %v1641_v55 }
  0x7e   : > { %371 = vmatmul.mubr.f32.gmra.mxu0 %v1646_v56 }
  0x7f   : > { %375 = vmatprep.mubr.f32.mxu0 %v1649_v57 }
  0x82   : > { %376 = vmatmul.mubr.f32.gmra.mxu0 %v1654_v58 }
  0x83   : > { %380 = vmatprep.mubr.f32.mxu0 %v1657_v59 }
  0x86   : > { %381 = vmatmul.mubr.f32.gmra.mxu0 %v1662_v60 }
  0x87   : > { %385 = vmatprep.mubr.f32.mxu0 %v1665_v61 }
  0x8a   : > { %386 = vmatmul.mubr.f32.gmra.mxu0 %v1670_v62 }
  0x8b   : > { %390 = vmatprep.mubr.f32.mxu0 %v1673_v63 }
  0x8e   : > { %391 = vmatmul.mubr.f32.gmra.mxu0 %v1678_v0 }
  0x8f   : > { %395 = vmatprep.mubr.f32.mxu0 %v1681_v1 }
  0x92   : > { %396 = vmatmul.mubr.f32.gmra.mxu0 %v1686_v2 }
 0x116   : > { %v999_v9 = vpop.f32.mrf.mxu0 }
 0x118   : > { %v1000_v10 = vpop.f32.mrf.mxu0 }
 0x119   : > { %v1001_v11 = vadd.f32 %v1000_v10, %v999_v9 }
 0x11a   : > { %v1002_v12 = vpop.f32.mrf.mxu0 }
 0x11b   : > { %941 = vmatmul.mubr.msk.f32.vlgmr.msra.gmra.mxu1 %vm409_vm0, %v1001_v11 }
 0x11c   : > { %v1003_v14 = vpop.f32.mrf.mxu0  ;;  %528 = vmatprep.mubr.f32.mxu1 %v1323_v8 }
 0x11d   : > { %v1004_v15 = vadd.f32 %v1003_v14, %v1002_v12 }
 0x11e   : > { %v1005_v16 = vpop.f32.mrf.mxu0 }
 0x11f   : > { %942 = vmatmul.mubr.msk.f32.gmra.mxu1 %vm409_vm0, %v1004_v15 }
 0x120   : > { %v1006_v17 = vpop.f32.mrf.mxu0  ;;  %534 = vmatprep.mubr.f32.mxu1 %v1323_v8 }
 0x121   : > { %v1007_v18 = vadd.f32 %v1006_v17, %v1005_v16 }
 0x122   : > { %v1008_v19 = vpop.f32.mrf.mxu0 }
 0x123   : > { %943 = vmatmul.mubr.msk.f32.gmra.mxu1 %vm409_vm0, %v1007_v18 }
 0x124   : > { %v1009_v20 = vpop.f32.mrf.mxu0  ;;  %540 = vmatprep.mubr.f32.mxu1 %v1323_v8 }
 0x125   : > { %v1010_v21 = vadd.f32 %v1009_v20, %v1008_v19 }
 0x126   : > { %v1011_v22 = vpop.f32.mrf.mxu0 }
 0x127   : > { %944 = vmatmul.mubr.msk.f32.gmra.mxu1 %vm409_vm0, %v1010_v21 }
 0x128   : > { %v1012_v23 = vpop.f32.mrf.mxu0  ;;  %546 = vmatprep.mubr.f32.mxu1 %v1323_v8 }
 0x129   : > { %v1013_v24 = vadd.f32 %v1012_v23, %v1011_v22 }
 0x12a   : > { %v1014_v25 = vpop.f32.mrf.mxu0 }
 0x12b   : > { %945 = vmatmul.mubr.msk.f32.gmra.mxu1 %vm409_vm0, %v1013_v24 }
 0x12c   : > { %v1015_v26 = vpop.f32.mrf.mxu0  ;;  %552 = vmatprep.mubr.f32.mxu1 %v1323_v8 }
 0x12d   : > { %v1016_v27 = vadd.f32 %v1015_v26, %v1014_v25 }
 0x12e   : > { %v1017_v28 = vpop.f32.mrf.mxu0 }
 0x12f   : > { %946 = vmatmul.mubr.msk.f32.gmra.mxu1 %vm409_vm0, %v1016_v27 }
 0x130   : > { %v1018_v29 = vpop.f32.mrf.mxu0  ;;  %558 = vmatprep.mubr.f32.mxu1 %v1323_v8 }
 0x131   : > { %v1019_v30 = vadd.f32 %v1018_v29, %v1017_v28 }
 0x132   : > { %v1020_v31 = vpop.f32.mrf.mxu0 }
 0x133   : > { %947 = vmatmul.mubr.msk.f32.gmra.mxu1 %vm409_vm0, %v1019_v30 }
 0x134   : > { %v1021_v32 = vpop.f32.mrf.mxu0  ;;  %564 = vmatprep.mubr.f32.mxu1 %v1323_v8 }
 0x135   : > { %v1022_v33 = vadd.f32 %v1021_v32, %v1020_v31 }
 0x136   : > { %v1023_v34 = vpop.f32.mrf.mxu0 }
 0x137   : > { %948 = vmatmul.mubr.msk.f32.gmra.mxu1 %vm409_vm0, %v1022_v33 }
 0x138   : > { %v1024_v35 = vpop.f32.mrf.mxu0  ;;  %570 = vmatprep.mubr.f32.mxu1 %v1323_v8 }
 0x139   : > { %v1025_v3 = vadd.f32 %v1024_v35, %v1023_v34 }
 0x13a   : > { %v1026_v4 = vpop.f32.mrf.mxu0 }
 0x13b   : > { %949 = vmatmul.mubr.msk.f32.gmra.mxu1 %vm409_vm0, %v1025_v3 }
 0x13c   : > { %v1027_v5 = vpop.f32.mrf.mxu0  ;;  %576 = vmatprep.mubr.f32.mxu1 %v1323_v8 }
 0x13d   : > { %v1028_v6 = vadd.f32 %v1027_v5, %v1026_v4 }
 0x13e   : > { %v1029_v7 = vpop.f32.mrf.mxu0 }
 0x13f   : > { %950 = vmatmul.mubr.msk.f32.gmra.mxu1 %vm409_vm0, %v1028_v6 }
 0x140   : > { %v1030_v9 = vpop.f32.mrf.mxu0  ;;  %582 = vmatprep.mubr.f32.mxu1 %v1323_v8 }
 0x141   : > { %v1031_v10 = vadd.f32 %v1030_v9, %v1029_v7 }
 0x142   : > { %v1032_v11 = vpop.f32.mrf.mxu0 }
 0x143   : > { %951 = vmatmul.mubr.msk.f32.gmra.mxu1 %vm409_vm0, %v1031_v10 }
 0x144   : > { %v1033_v12 = vpop.f32.mrf.mxu0  ;;  %588 = vmatprep.mubr.f32.mxu1 %v1323_v8 }
 0x145   : > { %v1034_v14 = vadd.f32 %v1033_v12, %v1032_v11 }
 0x146   : > { %v1035_v15 = vpop.f32.mrf.mxu0 }
 0x147   : > { %952 = vmatmul.mubr.msk.f32.gmra.mxu1 %vm409_vm0, %v1034_v14 }
 0x148   : > { %v1036_v16 = vpop.f32.mrf.mxu0  ;;  %594 = vmatprep.mubr.f32.mxu1 %v1323_v8 }
 0x149   : > { %v1037_v17 = vadd.f32 %v1036_v16, %v1035_v15 }
 0x14a   : > { %v1038_v18 = vpop.f32.mrf.mxu0 }
 0x14b   : > { %953 = vmatmul.mubr.msk.f32.gmra.mxu1 %vm409_vm0, %v1037_v17 }
 0x14c   : > { %v1039_v19 = vpop.f32.mrf.mxu0  ;;  %600 = vmatprep.mubr.f32.mxu1 %v1323_v8 }
 0x14d   : > { %v1040_v20 = vadd.f32 %v1039_v19, %v1038_v18 }
 0x14e   : > { %v1041_v21 = vpop.f32.mrf.mxu0 }
 0x14f   : > { %954 = vmatmul.mubr.msk.f32.gmra.mxu1 %vm409_vm0, %v1040_v20 }
 0x150   : > { %v1042_v22 = vpop.f32.mrf.mxu0  ;;  %606 = vmatprep.mubr.f32.mxu1 %v1323_v8 }
 0x151   : > { %v1043_v23 = vadd.f32 %v1042_v22, %v1041_v21 }
 0x152   : > { %v1044_v24 = vpop.f32.mrf.mxu0 }
 0x153   : > { %955 = vmatmul.mubr.msk.f32.gmra.mxu1 %vm409_vm0, %v1043_v23 }
 0x154   : > { %v1045_v25 = vpop.f32.mrf.mxu0  ;;  %612 = vmatprep.mubr.f32.mxu1 %v1323_v8 }
 0x155   : > { %v1046_v26 = vadd.f32 %v1045_v25, %v1044_v24 }
 0x157   : > { %956 = vmatmul.mubr.msk.f32.gmra.mxu1 %vm409_vm0, %v1046_v26 }
 0x1db   : > { %v524_v27 = vpop.f32.mrf.mxu1 }
 0x1dc   : > { %v619_v28 = vsub.f32 0.0, %v524_v27 }
 0x1dd   : > { %v526_v29 = vpop.f32.mrf.mxu1 }
 0x1de   : > { %v651_v30 = vmul.f32 1.442695, %v619_v28  ;;  %v620_v31 = vsub.f32 0.0, %v526_v29 }
 0x1df   : > { %v530_v32 = vpop.f32.mrf.mxu1 }
 0x1e0   : > { %1098 = vpow2.f32 %v651_v30  ;;  %v653_v33 = vmul.f32 1.442695, %v620_v31  ;;  %v621_v34 = vsub.f32 0.0, %v530_v32 }
 0x1e1   : > { %v532_v35 = vpop.f32.mrf.mxu1 }
 0x1e2   : > { %1100 = vpow2.f32 %v653_v33  ;;  %v655_v3 = vmul.f32 1.442695, %v621_v34  ;;  %v622_v4 = vsub.f32 0.0, %v532_v35 }
 0x1e3   : > { %v536_v5 = vpop.f32.mrf.mxu1 }
 0x1e4   : > { %1102 = vpow2.f32 %v655_v3  ;;  %v657_v6 = vmul.f32 1.442695, %v622_v4  ;;  %v623_v8 = vsub.f32 0.0, %v536_v5 }
 0x1e5   : > { %v538_v7 = vpop.f32.mrf.mxu1 }
 0x1e6   : > { %1104 = vpow2.f32 %v657_v6  ;;  %v659_v9 = vmul.f32 1.442695, %v623_v8  ;;  %v624_v10 = vsub.f32 0.0, %v538_v7 }
 0x1e7   : > { %v542_v11 = vpop.f32.mrf.mxu1 }
 0x1e8   : > { %1106 = vpow2.f32 %v659_v9  ;;  %v661_v12 = vmul.f32 1.442695, %v624_v10  ;;  %v625_v14 = vsub.f32 0.0, %v542_v11 }
 0x1e9   : > { %v544_v15 = vpop.f32.mrf.mxu1 }
 0x1ea   : > { %1108 = vpow2.f32 %v661_v12  ;;  %v663_v16 = vmul.f32 1.442695, %v625_v14  ;;  %v626_v17 = vsub.f32 0.0, %v544_v15 }
 0x1eb   : > { %v548_v18 = vpop.f32.mrf.mxu1 }
 0x1ec   : > { %1110 = vpow2.f32 %v663_v16  ;;  %v665_v19 = vmul.f32 1.442695, %v626_v17  ;;  %v627_v20 = vsub.f32 0.0, %v548_v18 }
 0x1ed   : > { %v1099_v21 = vpop.eup %1098  ;;  %v550_v22 = vpop.f32.mrf.mxu1 }
 0x1ee   : > { %v715_v23 = vadd.f32 1.0, %v1099_v21  ;;  %1112 = vpow2.f32 %v665_v19  ;;  %v667_v24 = vmul.f32 1.442695, %v627_v20  ;;  %v628_v25 = vsub.f32 0.0, %v550_v22 }
 0x1ef   : > { %v1101_v26 = vpop.eup %1100  ;;  %v554_v27 = vpop.f32.mrf.mxu1 }
 0x1f0   : > { %1114 = vrcp.f32 %v715_v23  ;;  %v716_v28 = vadd.f32 1.0, %v1101_v26  ;;  %v669_v29 = vmul.f32 1.442695, %v628_v25  ;;  %v629_v30 = vsub.f32 0.0, %v554_v27 }
 0x1f1   : > { %v1103_v31 = vpop.eup %1102  ;;  %1116 = vpow2.f32 %v667_v24  ;;  %v556_v32 = vpop.f32.mrf.mxu1 }
 0x1f2   : > { %1118 = vrcp.f32 %v716_v28  ;;  %v717_v33 = vadd.f32 1.0, %v1103_v31  ;;  %v671_v34 = vmul.f32 1.442695, %v629_v30  ;;  %v630_v35 = vsub.f32 0.0, %v556_v32 }
 0x1f3   : > { %v1105_v3 = vpop.eup %1104  ;;  %1120 = vpow2.f32 %v669_v29  ;;  %v560_v4 = vpop.f32.mrf.mxu1 }
 0x1f4   : > { %1122 = vrcp.f32 %v717_v33  ;;  %v718_v5 = vadd.f32 1.0, %v1105_v3  ;;  %v673_v6 = vmul.f32 1.442695, %v630_v35  ;;  %v631_v8 = vsub.f32 0.0, %v560_v4 }
 0x1f5   : > { %v1107_v7 = vpop.eup %1106  ;;  %1124 = vpow2.f32 %v671_v34  ;;  %v562_v9 = vpop.f32.mrf.mxu1 }
 0x1f6   : > { %1126 = vrcp.f32 %v718_v5  ;;  %v719_v10 = vadd.f32 1.0, %v1107_v7  ;;  %v675_v11 = vmul.f32 1.442695, %v631_v8  ;;  %v632_v12 = vsub.f32 0.0, %v562_v9 }
 0x1f7   : > { %v1109_v14 = vpop.eup %1108  ;;  %1128 = vpow2.f32 %v673_v6  ;;  %v566_v15 = vpop.f32.mrf.mxu1 }
 0x1f8   : > { %1130 = vrcp.f32 %v719_v10  ;;  %v720_v16 = vadd.f32 1.0, %v1109_v14  ;;  %v677_v17 = vmul.f32 1.442695, %v632_v12  ;;  %v633_v18 = vsub.f32 0.0, %v566_v15 }
 0x1f9   : > { %v1111_v19 = vpop.eup %1110  ;;  %1132 = vpow2.f32 %v675_v11  ;;  %v568_v20 = vpop.f32.mrf.mxu1 }
 0x1fa   : > { %1134 = vrcp.f32 %v720_v16  ;;  %v721_v21 = vadd.f32 1.0, %v1111_v19  ;;  %v679_v22 = vmul.f32 1.442695, %v633_v18  ;;  %v634_v23 = vsub.f32 0.0, %v568_v20 }
 0x1fb   : > { %v1113_v24 = vpop.eup %1112  ;;  %1136 = vpow2.f32 %v677_v17  ;;  %v572_v25 = vpop.f32.mrf.mxu1 }
 0x1fc   : > { %1138 = vrcp.f32 %v721_v21  ;;  %v722_v26 = vadd.f32 1.0, %v1113_v24  ;;  %v681_v27 = vmul.f32 1.442695, %v634_v23  ;;  %v635_v28 = vsub.f32 0.0, %v572_v25 }
 0x1fd   : > { %v1115_v29 = vpop.eup %1114  ;;  %1140 = vpow2.f32 %v679_v22  ;;  %v574_v30 = vpop.f32.mrf.mxu1 }
 0x1fe   : > { %v1117_v31 = vpop.eup %1116  ;;  %v779_v32 = vmul.f32 %v1115_v29, %v1566_v36  ;;  %1142 = vrcp.f32 %v722_v26  ;;  %v683_v33 = vmul.f32 1.442695, %v635_v28  ;;  %v636_v34 = vsub.f32 0.0, %v574_v30 }
 0x1ff   : > { %v1119_v35 = vpop.eup %1118  ;;  %v723_v3 = vadd.f32 1.0, %v1117_v31  ;;  %1144 = vpow2.f32 %v681_v27  ;;  %v578_v4 = vpop.f32.mrf.mxu1 }
 0x200   : > { %v1121_v5 = vpop.eup %1120  ;;  %811 = vst [vmem:[%s1739_s17] sm:$0xff] %v779_v32  ;;  %v780_v6 = vmul.f32 %v1119_v35, %v1496_v13  ;;  %1146 = vpow2.f32 %v683_v33  ;;  %v685_v8 = vmul.f32 1.442695, %v636_v34  ;;  %v637_v7 = vsub.f32 0.0, %v578_v4 }
 0x201   : > { %v1123_v36 = vpop.eup %1122  ;;  %1148 = vrcp.f32 %v723_v3  ;;  %v724_v9 = vadd.f32 1.0, %v1121_v5  ;;  %v580_v10 = vpop.f32.mrf.mxu1 }
 0x202   : > { %v1125_v11 = vpop.eup %1124  ;;  %812 = vst [vmem:[%s1739_s17 + $0x8] sm:$0xff] %v780_v6  ;;  %v781_v12 = vmul.f32 %v1123_v36, %v1574_v38  ;;  %1150 = vpow2.f32 %v685_v8  ;;  %v687_v14 = vmul.f32 1.442695, %v637_v7  ;;  %v638_v15 = vsub.f32 0.0, %v580_v10 }
 0x203   : > { %v1127_v16 = vpop.eup %1126  ;;  %1152 = vrcp.f32 %v724_v9  ;;  %v725_v17 = vadd.f32 1.0, %v1125_v11  ;;  %v584_v13 = vpop.f32.mrf.mxu1 }
 0x204   : > { %v1129_v18 = vpop.eup %1128  ;;  %813 = vst [vmem:[%s1739_s17 + $0x10] sm:$0xff] %v781_v12  ;;  %v782_v19 = vmul.f32 %v1127_v16, %v1569_v37  ;;  %1154 = vpow2.f32 %v687_v14  ;;  %v689_v20 = vmul.f32 1.442695, %v638_v15  ;;  %v639_v21 = vsub.f32 0.0, %v584_v13 }
 0x205   : > { %v1131_v22 = vpop.eup %1130  ;;  %1156 = vrcp.f32 %v725_v17  ;;  %v726_v23 = vadd.f32 1.0, %v1129_v18  ;;  %v586_v38 = vpop.f32.mrf.mxu1 }
 0x206   : > { %v1133_v24 = vpop.eup %1132  ;;  %814 = vst [vmem:[%s1739_s17 + $0x18] sm:$0xff] %v782_v19  ;;  %v783_v25 = vmul.f32 %v1131_v22, %v1582_v40  ;;  %1158 = vpow2.f32 %v689_v20  ;;  %v691_v26 = vmul.f32 1.442695, %v639_v21  ;;  %v640_v27 = vsub.f32 0.0, %v586_v38 }
 0x207   : > { %v1135_v28 = vpop.eup %1134  ;;  %1160 = vrcp.f32 %v726_v23  ;;  %v727_v29 = vadd.f32 1.0, %v1133_v24  ;;  %v590_v37 = vpop.f32.mrf.mxu1 }
 0x208   : > { %v1137_v30 = vpop.eup %1136  ;;  %815 = vst [vmem:[%s1739_s17 + $0x20] sm:$0xff] %v783_v25  ;;  %v784_v31 = vmul.f32 %v1135_v28, %v1577_v39  ;;  %1162 = vpow2.f32 %v691_v26  ;;  %v693_v32 = vmul.f32 1.442695, %v640_v27  ;;  %v641_v33 = vsub.f32 0.0, %v590_v37 }
 0x209   : > { %v1139_v34 = vpop.eup %1138  ;;  %1164 = vrcp.f32 %v727_v29  ;;  %v728_v35 = vadd.f32 1.0, %v1137_v30  ;;  %v592_v40 = vpop.f32.mrf.mxu1 }
 0x20a   : > { %v1141_v3 = vpop.eup %1140  ;;  %816 = vst [vmem:[%s1739_s17 + $0x28] sm:$0xff] %v784_v31  ;;  %v785_v4 = vmul.f32 %v1139_v34, %v1590_v42  ;;  %1166 = vpow2.f32 %v693_v32  ;;  %v695_v5 = vmul.f32 1.442695, %v641_v33  ;;  %v642_v6 = vsub.f32 0.0, %v592_v40 }
 0x20b   : > { %v1143_v8 = vpop.eup %1142  ;;  %1168 = vrcp.f32 %v728_v35  ;;  %v729_v7 = vadd.f32 1.0, %v1141_v3  ;;  %v596_v39 = vpop.f32.mrf.mxu1 }
 0x20c   : > { %v1145_v36 = vpop.eup %1144  ;;  %817 = vst [vmem:[%s1739_s17 + $0x30] sm:$0xff] %v785_v4  ;;  %v786_v9 = vmul.f32 %v1143_v8, %v1585_v41  ;;  %1170 = vpow2.f32 %v695_v5  ;;  %v697_v10 = vmul.f32 1.442695, %v642_v6  ;;  %v643_v11 = vsub.f32 0.0, %v596_v39 }
 0x20d   : > { %v1147_v12 = vpop.eup %1146  ;;  %1172 = vrcp.f32 %v729_v7  ;;  %v730_v14 = vadd.f32 1.0, %v1145_v36  ;;  %v598_v15 = vpop.f32.mrf.mxu1 }
 0x20e   : > { %v1149_v42 = vpop.eup %1148  ;;  %818 = vst [vmem:[%s1739_s17 + $0x38] sm:$0xff] %v786_v9  ;;  %v731_v16 = vadd.f32 1.0, %v1147_v12  ;;  %1174 = vpow2.f32 %v697_v10  ;;  %v699_v17 = vmul.f32 1.442695, %v643_v11  ;;  %v644_v13 = vsub.f32 0.0, %v598_v15 }
 0x20f   : > { %v1151_v18 = vpop.eup %1150  ;;  %v787_v19 = vmul.f32 %v1149_v42, %v1598_v44  ;;  %1176 = vrcp.f32 %v730_v14  ;;  %v602_v20 = vpop.f32.mrf.mxu1 }
 0x210   : > { %v1153_v41 = vpop.eup %1152  ;;  %1178 = vrcp.f32 %v731_v16  ;;  %v732_v21 = vadd.f32 1.0, %v1151_v18  ;;  %v701_v22 = vmul.f32 1.442695, %v644_v13  ;;  %v645_v23 = vsub.f32 0.0, %v602_v20 }
 0x211   : > { %v1155_v38 = vpop.eup %1154  ;;  %819 = vst [vmem:[%s1739_s17 + $0x40] sm:$0xff] %v787_v19  ;;  %v788_v24 = vmul.f32 %v1153_v41, %v1593_v43  ;;  %1180 = vpow2.f32 %v699_v17  ;;  %v604_v25 = vpop.f32.mrf.mxu1 }
 0x212   : > { %v1157_v26 = vpop.eup %1156  ;;  %1182 = vrcp.f32 %v732_v21  ;;  %v733_v27 = vadd.f32 1.0, %v1155_v38  ;;  %v703_v28 = vmul.f32 1.442695, %v645_v23  ;;  %v646_v44 = vsub.f32 0.0, %v604_v25 }
 0x213   : > { %v1159_v29 = vpop.eup %1158  ;;  %820 = vst [vmem:[%s1739_s17 + $0x48] sm:$0xff] %v788_v24  ;;  %v789_v37 = vmul.f32 %v1157_v26, %v1606_v46  ;;  %1184 = vpow2.f32 %v701_v22  ;;  %v608_v30 = vpop.f32.mrf.mxu1 }
 0x214   : > { %v1161_v31 = vpop.eup %1160  ;;  %1186 = vrcp.f32 %v733_v27  ;;  %v734_v32 = vadd.f32 1.0, %v1159_v29  ;;  %v705_v33 = vmul.f32 1.442695, %v646_v44  ;;  %v647_v43 = vsub.f32 0.0, %v608_v30 }
 0x215   : > { %v1163_v34 = vpop.eup %1162  ;;  %821 = vst [vmem:[%s1739_s17 + $0x50] sm:$0xff] %v789_v37  ;;  %v790_v35 = vmul.f32 %v1161_v31, %v1601_v45  ;;  %1188 = vpow2.f32 %v703_v28  ;;  %v610_v40 = vpop.f32.mrf.mxu1 }
 0x216   : > { %v1165_v3 = vpop.eup %1164  ;;  %1190 = vrcp.f32 %v734_v32  ;;  %v735_v4 = vadd.f32 1.0, %v1163_v34  ;;  %v707_v5 = vmul.f32 1.442695, %v647_v43  ;;  %v648_v46 = vsub.f32 0.0, %v610_v40 }
 0x217   : > { %v1167_v6 = vpop.eup %1166  ;;  %822 = vst [vmem:[%s1739_s17 + $0x58] sm:$0xff] %v790_v35  ;;  %v791_v8 = vmul.f32 %v1165_v3, %v1614_v48  ;;  %1192 = vpow2.f32 %v705_v33  ;;  %v614_v7 = vpop.f32.mrf.mxu1 }
 0x218   : > { %v1169_v39 = vpop.eup %1168  ;;  %1194 = vrcp.f32 %v735_v4  ;;  %v736_v36 = vadd.f32 1.0, %v1167_v6  ;;  %v709_v9 = vmul.f32 1.442695, %v648_v46  ;;  %v649_v45 = vsub.f32 0.0, %v614_v7 }
 0x219   : > { %v1171_v10 = vpop.eup %1170  ;;  %823 = vst [vmem:[%s1739_s17 + $0x60] sm:$0xff] %v791_v8  ;;  %v792_v11 = vmul.f32 %v1169_v39, %v1609_v47  ;;  %1196 = vpow2.f32 %v707_v5  ;;  %v616_v12 = vpop.f32.mrf.mxu1 }
 0x21a   : > { %v1173_v14 = vpop.eup %1172  ;;  %1198 = vrcp.f32 %v736_v36  ;;  %v737_v15 = vadd.f32 1.0, %v1171_v10  ;;  %v711_v42 = vmul.f32 1.442695, %v649_v45  ;;  %v650_v48 = vsub.f32 0.0, %v616_v12 }
 0x21b   : > { %v1175_v16 = vpop.eup %1174  ;;  %824 = vst [vmem:[%s1739_s17 + $0x68] sm:$0xff] %v792_v11  ;;  %v793_v17 = vmul.f32 %v1173_v14, %v1622_v50  ;;  %1200 = vpow2.f32 %v709_v9 }
 0x21c   : > { %v1177_v13 = vpop.eup %1176  ;;  %1202 = vrcp.f32 %v737_v15  ;;  %v738_v18 = vadd.f32 1.0, %v1175_v16  ;;  %v713_v19 = vmul.f32 1.442695, %v650_v48 }
 0x21d   : > { %v1179_v47 = vpop.eup %1178  ;;  %825 = vst [vmem:[%s1739_s17 + $0x70] sm:$0xff] %v793_v17  ;;  %v794_v20 = vmul.f32 %v1177_v13, %v1617_v49  ;;  %1204 = vpow2.f32 %v711_v42 }
 0x21e   : > { %v1181_v41 = vpop.eup %1180  ;;  %v795_v21 = vmul.f32 %v1179_v47, %v1630_v52  ;;  %1206 = vrcp.f32 %v738_v18 }
 0x21f   : > { %v1183_v22 = vpop.eup %1182  ;;  %826 = vst [vmem:[%s1739_s17 + $0x78] sm:$0xff] %v794_v20  ;;  %v739_v50 = vadd.f32 1.0, %v1181_v41  ;;  %1208 = vpow2.f32 %v713_v19 }
 0x220   : > { %v1185_v23 = vpop.eup %1184  ;;  %827 = vst [vmem:[%s1739_s17 + $0x80] sm:$0xff] %v795_v21  ;;  %v796_v38 = vmul.f32 %v1183_v22, %v1625_v51 }
 0x221   : > { %v1187_v24 = vpop.eup %1186  ;;  %1210 = vrcp.f32 %v739_v50  ;;  %v740_v25 = vadd.f32 1.0, %v1185_v23 }
 0x222   : > { %v1189_v49 = vpop.eup %1188  ;;  %828 = vst [vmem:[%s1739_s17 + $0x88] sm:$0xff] %v796_v38  ;;  %v797_v26 = vmul.f32 %v1187_v24, %v1638_v54 }
 0x223   : > { %v1191_v27 = vpop.eup %1190  ;;  %1212 = vrcp.f32 %v740_v25  ;;  %v741_v52 = vadd.f32 1.0, %v1189_v49 }
 0x224   : > { %v1193_v28 = vpop.eup %1192  ;;  %829 = vst [vmem:[%s1739_s17 + $0x90] sm:$0xff] %v797_v26  ;;  %v798_v44 = vmul.f32 %v1191_v27, %v1633_v53 }
 0x225   : > { %v1195_v29 = vpop.eup %1194  ;;  %1214 = vrcp.f32 %v741_v52  ;;  %v742_v51 = vadd.f32 1.0, %v1193_v28 }
 0x226   : > { %v1197_v37 = vpop.eup %1196  ;;  %830 = vst [vmem:[%s1739_s17 + $0x98] sm:$0xff] %v798_v44  ;;  %v799_v30 = vmul.f32 %v1195_v29, %v1646_v56 }
 0x227   : > { %v1199_v31 = vpop.eup %1198  ;;  %1216 = vrcp.f32 %v742_v51  ;;  %v743_v54 = vadd.f32 1.0, %v1197_v37 }
 0x228   : > { %v1201_v32 = vpop.eup %1200  ;;  %831 = vst [vmem:[%s1739_s17 + $0xa0] sm:$0xff] %v799_v30  ;;  %v800_v33 = vmul.f32 %v1199_v31, %v1641_v55 }
 0x229   : > { %v1203_v43 = vpop.eup %1202  ;;  %1218 = vrcp.f32 %v743_v54  ;;  %v744_v53 = vadd.f32 1.0, %v1201_v32 }
 0x22a   : > { %v1205_v34 = vpop.eup %1204  ;;  %832 = vst [vmem:[%s1739_s17 + $0xa8] sm:$0xff] %v800_v33  ;;  %v801_v35 = vmul.f32 %v1203_v43, %v1654_v58 }
 0x22b   : > { %v1207_v40 = vpop.eup %1206  ;;  %1220 = vrcp.f32 %v744_v53  ;;  %v745_v56 = vadd.f32 1.0, %v1205_v34 }
 0x22c   : > { %v1209_v3 = vpop.eup %1208  ;;  %833 = vst [vmem:[%s1739_s17 + $0xb0] sm:$0xff] %v801_v35  ;;  %v802_v4 = vmul.f32 %v1207_v40, %v1649_v57 }
 0x22d   : > { %1222 = vrcp.f32 %v745_v56  ;;  %v746_v55 = vadd.f32 1.0, %v1209_v3 }
 0x22e   : > { %v1211_v5 = vpop.eup %1210  ;;  %834 = vst [vmem:[%s1739_s17 + $0xb8] sm:$0xff] %v802_v4 }
 0x22f   : > { %v803_v46 = vmul.f32 %v1211_v5, %v1662_v60  ;;  %1224 = vrcp.f32 %v746_v55 }
 0x230   : > { %v1213_v58 = vpop.eup %1212 }
 0x231   : > { %835 = vst [vmem:[%s1739_s17 + $0xc0] sm:$0xff] %v803_v46  ;;  %v804_v6 = vmul.f32 %v1213_v58, %v1657_v59 }
 0x232   : > { %v1215_v8 = vpop.eup %1214 }
 0x233   : > { %836 = vst [vmem:[%s1739_s17 + $0xc8] sm:$0xff] %v804_v6  ;;  %v805_v57 = vmul.f32 %v1215_v8, %v1670_v62 }
 0x234   : > { %v1217_v7 = vpop.eup %1216 }
 0x235   : > { %837 = vst [vmem:[%s1739_s17 + $0xd0] sm:$0xff] %v805_v57  ;;  %v806_v39 = vmul.f32 %v1217_v7, %v1665_v61 }
 0x236   : > { %v1219_v36 = vpop.eup %1218 }
 0x237   : > { %838 = vst [vmem:[%s1739_s17 + $0xd8] sm:$0xff] %v806_v39  ;;  %v807_v60 = vmul.f32 %v1219_v36, %v1678_v0 }
 0x238   : > { %v1221_v9 = vpop.eup %1220 }
 0x239   : > { %839 = vst [vmem:[%s1739_s17 + $0xe0] sm:$0xff] %v807_v60  ;;  %v808_v59 = vmul.f32 %v1221_v9, %v1673_v63 }
 0x23a   : > { %v1223_v45 = vpop.eup %1222 }
 0x23b   : > { %840 = vst [vmem:[%s1739_s17 + $0xe8] sm:$0xff] %v808_v59  ;;  %v809_v62 = vmul.f32 %v1223_v45, %v1686_v2 }
 0x23c   : > { %v1225_v10 = vpop.eup %1224 }
 0x23d   : > { %841 = vst [vmem:[%s1739_s17 + $0xf0] sm:$0xff] %v809_v62  ;;  %v810_v61 = vmul.f32 %v1225_v10, %v1681_v1 }
 0x23f   : > { %842 = vst [vmem:[%s1739_s17 + $0xf8] sm:$0xff] %v810_v61 }
 0x240   : > { %1267 = shalt.err (!%p1264_p10)
}
 0x241   : > { %s1268_s30 = scalar_lea.hbm %s1806_s23, 4096  ;;  %s1272_s6 = scalar_lea.hbm %s1857_s3, 8192 }
 0x242   : > { %p1269_p0 = scmp.ne.s32.totalorder %s1806_s23, %s1268_s30  ;;  %p1273_p1 = scmp.lt.s32.totalorder %s1806_s23, %s1857_s3 }
 0x243   : > { %p1274_p3 = scmp.lt.s32.totalorder %s1272_s6, %s1268_s30 }
 0x244   : > { %p1270_p2 = pnand %p1269_p0, %p1866_p12 }
 0x245   : > { %p1275_p6 = por %p1274_p3, %p1273_p1 }
 0x246   : > { %p1271_p9 = pneg %p1270_p2 }
 0x248   : > { %p1276_p11 = pnand %p1275_p6, %p1271_p9 }
 0x24a   : > { %1279 = shalt.err (!%p1276_p11)
}
 0x24b   : > { %s1325_s8 = smov 256   ;;  %s1326_s17 = smov 16  }
 0x24c   : > { %1049 = dma.vmem_to_hbm [thread:$0]  (%p1866_p12), %s1808_s19, 4096, %s1806_s23, %s844_s16, %s1325_s8, %s1325_s8, %s1326_s17  }
 0x24d PF: > { %s873_s9 = sand.u32 1, %s1306_s12   ;;  %p1867_p13 = scmp.ne.s32.totalorder %s1863_s25, 0 }
 0x24e   : > { %p1868_p4 = scmp.ge.s32.totalorder %s1318_s15, 2  ;;  %s874_s20 = scalar_lea.sflag [#allocation4], %s873_s9 }
 0x250   : > { %p1056_p5 = pnand %p1868_p4, %p1867_p13 }
 0x252   : > { %p1057_p7 = pneg %p1056_p5 }
 0x254   : > { %1301 = dma.done.wait (%p1057_p7), %s874_s20, 4096  }
 0x255   : > { %1303 = vsyncadd (%p1057_p7), %s874_s20, 4294963200  ;;  %p16_p8 = scmp.ge.s32.totalorder %s1372_s18, 4   ;;  %s1869_s12 = smov %s1310_s13 }
 0x256   : > { %s1870_s13 = smov %s1314_s14  ;;  %s1871_s14 = smov %s1384_s21 }
 0x257   : > { %s1872_s15 = smov %s1372_s18  ;;  %18 = sbr.rel (!%p16_p8) target bundleno = 5 (0x5), region = 77 }
 0x25c   :  { %879 = vsyncpa [#allocation3], 1 }
 0x25d   :  { %881 = vsyncpa [#allocation3 + $0x1], 1 }
 0x25e   :  { %882 = vsyncpa [#allocation4], 1 }
 0x25f   :  { %884 = vsyncpa [#allocation4 + $0x1], 1 }

// kernel: tpu_custom_call.1
= control target key start
LH: loop header
LB: loop body
LE: loop exit
PB: predicated region body
PF: predicated region fallthrough
CT: control target
= control target key end

     0   :  { %8 = vsyncpa [#allocation3], 0  ;;  %s1854_s0 = inlined_call_operand.hbm [shape: f32[256,256], index: 0, kind: input, shape index: {}]   ;;  %s1855_s1 = inlined_call_operand.vmem [shape: f32[256,32], index: 1, kind: input, shape index: {}]   ;;  %s1856_s2 = inlined_call_operand.vmem [shape: f32[32,256], index: 2, kind: input, shape index: {}]   ;;  %s1857_s3 = inlined_call_operand.hbm [shape: f32[256,256], index: 3, kind: output, shape index: {}]  }
   0x1   :  { %10 = vsyncpa [#allocation3 + $0x1], 0 }
   0x2   :  { %11 = vsyncpa [#allocation4], 0 }
   0x3   :  { %13 = vsyncpa [#allocation4 + $0x1], 0  ;;  %s1347_s12 = smov 0   ;;  %s1349_s13 = smov 0  }
   0x4   :  { %s1351_s14 = smov 0   ;;  %s1353_s15 = smov 0  }
   0x5 LB: > { %s1368_s16 = sadd.s32 4294967295, %s1318_s15   ;;  %s931_s17 = sadd.s32 4294967294, %s1318_s15   ;;  %s1318_s15 = sphi %s1353_s15, %s1872_s15   ;;  %s1314_s14 = sphi %s1351_s14, %s1871_s14   ;;  %s1310_s13 = sphi %s1349_s13, %s1870_s13   ;;  %s1306_s12 = sphi %s1347_s12, %s1869_s12  }
   0x6   : > { %s1372_s18 = sadd.s32 1, %s1318_s15   ;;  %s26_s19 = sadd.s32 1, %s1314_s14 }
   0x7   : > { %s23_s20 = ssub.s32 %s1318_s15, %s1372_s18  ;;  %p33_p0 = scmp.ne.s32.totalorder %s1314_s14, %s1310_s13 }
   0x8   : > { %p24_p1 = scmp.eq.s32.totalorder %s23_s20, 0  ;;  %p34_p2 = scmp.eq.s32.totalorder %s1318_s15, 0 }
   0x9   : > { %p39_p3 = scmp.ne.s32.totalorder %s1310_s13, %s1306_s12  ;;  %p40_p4 = scmp.eq.s32.totalorder %s1368_s16, 0 }
   0xa   : > { %s1384_s21 = scalar_select %p24_p1, %s1314_s14, %s26_s19  }
   0xb   : > { %p1386_p5 = por %p34_p2, %p33_p0  ;;  %p1390_p6 = por %p40_p4, %p39_p3 }
   0xc   : > { %p105_p7 = scmp.eq.s32.totalorder %s1368_s16, 1  ;;  %p111_p8 = scmp.eq.s32.totalorder %s931_s17, 1 }
   0xd   : > { %s1861_s23 = scalar_select %p1390_p6, 1, 0 }
   0xe   : > { %p1059_p10 = scmp.lt.s32.totalorder %s1318_s15, 2  ;;  %p1397_p11 = por %p105_p7, %p33_p0 }
   0xf   : > { %p1401_p12 = por %p111_p8, %p39_p3  ;;  %s137_s26 = sand.u32 1, %s1314_s14  }
  0x10   : > { %s1862_s24 = scalar_select %p1397_p11, 1, 0 }
  0x11   : > { %s1863_s25 = scalar_select %p1401_p12, 1, 0 }
  0x12   : > { %s964_s27 = sshll.u32 %s1318_s15, 12  ;;  %s934_s28 = sshll.u32 %s137_s26, 8 }
  0x13   : > { %s1410_s4 = scalar_lea.hbm %s1854_s0, %s964_s27  ;;  %s141_s5 = scalar_lea.vmem [#allocation2], %s934_s28 }
  0x14   : > { %s149_s6 = sshll.u32 %s141_s5, 4  ;;  %p1414_p13 = pnand %p1059_p10, %p1386_p5  ;;  %s1418_s6 = int_to_ptr.vmem [resolvable:$true] %s149_s6 }
  0x15   : > { %s1420_s8 = scalar_lea.sflag [#allocation3], %s137_s26  ;;  %s1226_s9 = scalar_lea.hbm %s1410_s4, 4096 }
  0x16   : > { %p1227_p0 = scmp.ne.s32.totalorder %s1410_s4, %s1226_s9  ;;  %p1228_p1 = pneg %p1414_p13 }
  0x17   : > { %s1231_s17 = scalar_lea.hbm %s1854_s0, 8192  ;;  %p1232_p4 = scmp.lt.s32.totalorder %s1410_s4, %s1854_s0 }
  0x18   : > { %p1229_p2 = pnand %p1228_p1, %p1227_p0  ;;  %p1233_p5 = scmp.lt.s32.totalorder %s1231_s17, %s1226_s9 }
  0x1a   : > { %p1230_p3 = pneg %p1229_p2  ;;  %p1234_p7 = por %p1233_p5, %p1232_p4 }
  0x1c   : > { %p1235_p8 = pnand %p1234_p7, %p1230_p3 }
  0x1e   : > { %1238 = shalt.err (!%p1235_p8)
}
  0x1f   : > { %s1239_s22 = scalar_lea.vmem %s1418_s6, 4096  ;;  %s1320_s26 = smov [#allocation2]  }
  0x20   : > { %p1240_p10 = scmp.ne.s32.totalorder %s1418_s6, %s1239_s22  ;;  %s1244_s27 = sshll.u32 %s1320_s26, 4  ;;  %s1245_s27 = int_to_ptr.vmem [resolvable:$false] %s1244_s27 }
  0x21   : > { %s1246_s28 = scalar_lea.vmem %s1245_s27, 8192  ;;  %p1247_p2 = scmp.lt.s32.totalorder %s1418_s6, %s1245_s27 }
  0x22   : > { %p1242_p9 = pnand %p1240_p10, %p1228_p1  ;;  %p1248_p12 = scmp.lt.s32.totalorder %s1246_s28, %s1239_s22 }
  0x24   : > { %p1243_p0 = pneg %p1242_p9  ;;  %p1249_p11 = por %p1248_p12, %p1247_p2 }
  0x26   : > { %p1250_p6 = pnand %p1249_p11, %p1243_p0 }
  0x28   : > { %1253 = shalt.err (!%p1250_p6)
}
  0x29   : > { %s1321_s29 = smov 256   ;;  %s1322_s30 = smov 16  }
  0x2a   : > { %1054 = dma.hbm_to_vmem [thread:$0]  (!%p1414_p13), %s1410_s4, 4096, %s1418_s6, %s1420_s8, %s1321_s29, %s1321_s29, %s1322_s30  }
  0x2b   : > { %p938_p9 = scmp.ge.s32.totalorder %s1318_s15, 1  ;;  %p157_p1 = scmp.lt.s32.totalorder %s1318_s15, 3 }
  0x2d   : > { %p158_p3 = pnand %p938_p9, %p157_p1 }
  0x2e   : > { %s1444_s5 = sand.u32 (!%p158_p3), 1, %s1310_s13   ;;  %p1865_p6 = scmp.ne.s32.totalorder (!%p158_p3), %s1861_s23, 0 }
  0x2f   : > { %161 = sbr.rel (%p158_p3) target bundleno = 589 (0x24d), region = 32  ;;  %s939_s9 = sshll.u32 (!%p158_p3), %s1444_s5, 8 }
  0x30   : > { %s164_s10 = scalar_lea.sflag (!%p158_p3), [#allocation3], %s1444_s5  ;;  %s1450_s11 = scalar_lea.vmem (!%p158_p3), [#allocation2], %s939_s9 }
  0x34   : > { %1297 = dma.done.wait (%p1865_p6), %s164_s10, 4096  }
  0x35   : > { %1299 = vsyncadd (%p1865_p6), %s164_s10, 4294963200  ;;  %v255_v0 = vld [vmem:[%s1855_s1 + $0xf8] sm:$0xff]  ;;  %v254_v2 = vld [vmem:[%s1855_s1 + $0xf0] sm:$0xff]  ;;  %vm409_vm0 = vcmask 261120   ;;  %s1739_s17 = scalar_lea.vmem [#allocation5], %s939_s9  ;;  %s966_s9 = sshll.u32 %s1368_s16, 12 }
  0x36   : > { %v239_v1 = vld [vmem:[%s1855_s1 + $0x78] sm:$0xff]  ;;  %967 = vmatprep.subr.mxu0 %v255_v0  ;;  %v238_v3 = vld [vmem:[%s1855_s1 + $0x70] sm:$0xff]  ;;  %v253_v4 = vld [vmem:[%s1855_s1 + $0xe8] sm:$0xff]  ;;  %s858_s19 = sshll.u32 %s1739_s17, 4  ;;  %s1806_s23 = scalar_lea.hbm %s1857_s3, %s966_s9  ;;  %s1808_s19 = int_to_ptr.vmem [resolvable:$true] %s858_s19 }
  0x37   : > { %968 = vmatpush3.msra.mxu0 %v239_v1  ;;  %v237_v5 = vld [vmem:[%s1855_s1 + $0x68] sm:$0xff]  ;;  %v252_v6 = vld [vmem:[%s1855_s1 + $0xe0] sm:$0xff]  ;;  %v251_v8 = vld [vmem:[%s1855_s1 + $0xd8] sm:$0xff]  ;;  %s844_s16 = scalar_lea.sflag [#allocation4], %s1444_s5  ;;  %s1254_s26 = scalar_lea.vmem %s1808_s19, 4096 }
  0x38   : > { %969 = vmatprep.subr.mxu0 %v254_v2  ;;  %v236_v7 = vld [vmem:[%s1855_s1 + $0x60] sm:$0xff]  ;;  %v235_v9 = vld [vmem:[%s1855_s1 + $0x58] sm:$0xff]  ;;  %v250_v10 = vld [vmem:[%s1855_s1 + $0xd0] sm:$0xff]  ;;  %p1255_p11 = scmp.ne.s32.totalorder %s1808_s19, %s1254_s26  ;;  %p1866_p12 = scmp.ne.s32.totalorder %s1862_s24, 0 }
  0x39   : > { %970 = vmatpush3.msra.mxu0 %v238_v3  ;;  %v234_v11 = vld [vmem:[%s1855_s1 + $0x50] sm:$0xff]  ;;  %v249_v12 = vld [vmem:[%s1855_s1 + $0xc8] sm:$0xff]  ;;  %v248_v15 = vld [vmem:[%s1855_s1 + $0xc0] sm:$0xff]  ;;  %s1324_s27 = smov [#allocation5]  }
  0x3a   : > { %971 = vmatprep.subr.mxu0 %v253_v4  ;;  %v1496_v13 = vld [vmem:[%s1450_s11 + $0x8] sm:$0xff]  ;;  %v232_v16 = vld [vmem:[%s1855_s1 + $0x40] sm:$0xff]  ;;  %v247_v17 = vld [vmem:[%s1855_s1 + $0xb8] sm:$0xff]  ;;  %p1256_p13 = pnand %p1255_p11, %p1866_p12  ;;  %s1258_s28 = sshll.u32 %s1324_s27, 4  ;;  %s1259_s28 = int_to_ptr.vmem [resolvable:$false] %s1258_s28 }
  0x3b   : > { %972 = vmatpush3.msra.mxu0 %v237_v5  ;;  %v233_v14 = vld [vmem:[%s1855_s1 + $0x48] sm:$0xff]  ;;  %320 = vmatprep.mubr.f32.mxu0 %v1496_v13  ;;  %v231_v18 = vld [vmem:[%s1855_s1 + $0x38] sm:$0xff]  ;;  %v246_v19 = vld [vmem:[%s1855_s1 + $0xb0] sm:$0xff]  ;;  %s1260_s29 = scalar_lea.vmem %s1259_s28, 8192  ;;  %p1261_p5 = scmp.lt.s32.totalorder %s1808_s19, %s1259_s28 }
  0x3c   : > { %973 = vmatprep.subr.mxu0 %v252_v6  ;;  %v230_v20 = vld [vmem:[%s1855_s1 + $0x30] sm:$0xff]  ;;  %v245_v21 = vld [vmem:[%s1855_s1 + $0xa8] sm:$0xff]  ;;  %v244_v23 = vld [vmem:[%s1855_s1 + $0xa0] sm:$0xff]  ;;  %p1257_p4 = pneg %p1256_p13  ;;  %p1262_p7 = scmp.lt.s32.totalorder %s1260_s29, %s1254_s26 }
  0x3d   : > { %974 = vmatpush3.msra.mxu0 %v236_v7  ;;  %v229_v22 = vld [vmem:[%s1855_s1 + $0x28] sm:$0xff]  ;;  %v228_v24 = vld [vmem:[%s1855_s1 + $0x20] sm:$0xff]  ;;  %v408_v25 = vld [vmem:[%s1856_s2 + $0x38] sm:$0xff] }
  0x3e   : > { %975 = vmatprep.subr.mxu0 %v251_v8  ;;  %v407_v26 = vld [vmem:[%s1856_s2 + $0x30] sm:$0xff]  ;;  %v243_v27 = vld [vmem:[%s1855_s1 + $0x98] sm:$0xff]  ;;  %482 = vmatprep.subr.mxu1 %v408_v25  ;;  %v406_v28 = vld [vmem:[%s1856_s2 + $0x28] sm:$0xff]  ;;  %v1323_v8 = vmov 0.0   ;;  %p1263_p8 = por %p1262_p7, %p1261_p5 }
  0x3f   : > { %976 = vmatpush3.msra.mxu0 %v235_v9  ;;  %v227_v29 = vld [vmem:[%s1855_s1 + $0x18] sm:$0xff]  ;;  %483 = vmatpush1.msra.mxu1 %v407_v26  ;;  %v242_v30 = vld [vmem:[%s1855_s1 + $0x90] sm:$0xff]  ;;  %v241_v32 = vld [vmem:[%s1855_s1 + $0x88] sm:$0xff] }
  0x40   : > { %977 = vmatprep.subr.mxu0 %v250_v10  ;;  %484 = vmatprep.subr.mxu1 %v406_v28  ;;  %v226_v31 = vld [vmem:[%s1855_s1 + $0x10] sm:$0xff]  ;;  %v225_v33 = vld [vmem:[%s1855_s1 + $0x8] sm:$0xff]  ;;  %v240_v34 = vld [vmem:[%s1855_s1 + $0x80] sm:$0xff]  ;;  %p1264_p10 = pnand %p1263_p8, %p1257_p4 }
  0x41   : > { %978 = vmatpush3.msra.mxu0 %v234_v11  ;;  %v224_v35 = vld [vmem:[%s1855_s1] sm:$0xff]  ;;  %v1569_v37 = vld [vmem:[%s1450_s11 + $0x18] sm:$0xff]  ;;  %v1574_v38 = vld [vmem:[%s1450_s11 + $0x10] sm:$0xff]  ;;  %522 = vmatprep.mubr.f32.mxu1 %v1323_v8 }
  0x42   : > { %979 = vmatprep.subr.mxu0 %v249_v12  ;;  %v1566_v36 = vld [vmem:[%s1450_s11] sm:$0xff]  ;;  %v1577_v39 = vld [vmem:[%s1450_s11 + $0x28] sm:$0xff]  ;;  %v1585_v41 = vld [vmem:[%s1450_s11 + $0x38] sm:$0xff] }
  0x43   : > { %980 = vmatpush3.msra.mxu0 %v233_v14  ;;  %v1582_v40 = vld [vmem:[%s1450_s11 + $0x20] sm:$0xff]  ;;  %v1590_v42 = vld [vmem:[%s1450_s11 + $0x30] sm:$0xff]  ;;  %v1593_v43 = vld [vmem:[%s1450_s11 + $0x48] sm:$0xff] }
  0x44   : > { %981 = vmatprep.subr.mxu0 %v248_v15  ;;  %v1598_v44 = vld [vmem:[%s1450_s11 + $0x40] sm:$0xff]  ;;  %v1601_v45 = vld [vmem:[%s1450_s11 + $0x58] sm:$0xff]  ;;  %v1606_v46 = vld [vmem:[%s1450_s11 + $0x50] sm:$0xff] }
  0x45   : > { %982 = vmatpush3.msra.mxu0 %v232_v16  ;;  %v1609_v47 = vld [vmem:[%s1450_s11 + $0x68] sm:$0xff]  ;;  %v1614_v48 = vld [vmem:[%s1450_s11 + $0x60] sm:$0xff]  ;;  %v1617_v49 = vld [vmem:[%s1450_s11 + $0x78] sm:$0xff] }
  0x46   : > { %983 = vmatprep.subr.mxu0 %v247_v17  ;;  %v1622_v50 = vld [vmem:[%s1450_s11 + $0x70] sm:$0xff]  ;;  %v1625_v51 = vld [vmem:[%s1450_s11 + $0x88] sm:$0xff]  ;;  %v1630_v52 = vld [vmem:[%s1450_s11 + $0x80] sm:$0xff] }
  0x47   : > { %984 = vmatpush3.msra.mxu0 %v231_v18  ;;  %v1633_v53 = vld [vmem:[%s1450_s11 + $0x98] sm:$0xff]  ;;  %v1638_v54 = vld [vmem:[%s1450_s11 + $0x90] sm:$0xff]  ;;  %v1641_v55 = vld [vmem:[%s1450_s11 + $0xa8] sm:$0xff] }
  0x48   : > { %985 = vmatprep.subr.mxu0 %v246_v19  ;;  %v1646_v56 = vld [vmem:[%s1450_s11 + $0xa0] sm:$0xff]  ;;  %v1649_v57 = vld [vmem:[%s1450_s11 + $0xb8] sm:$0xff]  ;;  %v1654_v58 = vld [vmem:[%s1450_s11 + $0xb0] sm:$0xff] }
  0x49   : > { %986 = vmatpush3.msra.mxu0 %v230_v20  ;;  %v1657_v59 = vld [vmem:[%s1450_s11 + $0xc8] sm:$0xff]  ;;  %v1662_v60 = vld [vmem:[%s1450_s11 + $0xc0] sm:$0xff]  ;;  %v1665_v61 = vld [vmem:[%s1450_s11 + $0xd8] sm:$0xff] }
  0x4a   : > { %987 = vmatprep.subr.mxu0 %v245_v21  ;;  %v1670_v62 = vld [vmem:[%s1450_s11 + $0xd0] sm:$0xff]  ;;  %v1673_v63 = vld [vmem:[%s1450_s11 + $0xe8] sm:$0xff]  ;;  %v1678_v0 = vld [vmem:[%s1450_s11 + $0xe0] sm:$0xff] }
  0x4b   : > { %988 = vmatpush3.msra.mxu0 %v229_v22  ;;  %v1681_v1 = vld [vmem:[%s1450_s11 + $0xf8] sm:$0xff]  ;;  %v1686_v2 = vld [vmem:[%s1450_s11 + $0xf0] sm:$0xff]  ;;  %v405_v3 = vld [vmem:[%s1856_s2 + $0x20] sm:$0xff] }
  0x4c   : > { %989 = vmatprep.subr.mxu0 %v244_v23  ;;  %485 = vmatpush1.msra.mxu1 %v405_v3  ;;  %v404_v4 = vld [vmem:[%s1856_s2 + $0x18] sm:$0xff]  ;;  %v403_v5 = vld [vmem:[%s1856_s2 + $0x10] sm:$0xff]  ;;  %v402_v6 = vld [vmem:[%s1856_s2 + $0x8] sm:$0xff] }
  0x4d   : > { %990 = vmatpush3.msra.mxu0 %v228_v24  ;;  %486 = vmatprep.subr.mxu1 %v404_v4  ;;  %v401_v7 = vld [vmem:[%s1856_s2] sm:$0xff] }
  0x4e   : > { %991 = vmatprep.subr.mxu0 %v243_v27  ;;  %487 = vmatpush1.msra.mxu1 %v403_v5 }
  0x4f   : > { %992 = vmatpush3.msra.mxu0 %v227_v29  ;;  %488 = vmatprep.subr.mxu1 %v402_v6 }
  0x50   : > { %993 = vmatprep.subr.mxu0 %v242_v30  ;;  %489 = vmatpush1.msra.mxu1 %v401_v7 }
  0x51   : > { %994 = vmatpush3.msra.mxu0 %v226_v31 }
  0x52   : > { %995 = vmatprep.subr.mxu0 %v241_v32 }
  0x53   : > { %996 = vmatpush3.msra.mxu0 %v225_v33 }
  0x54   : > { %997 = vmatprep.subr.mxu0 %v240_v34 }
  0x55   : > { %998 = vmatpush3.msra.mxu0 %v224_v35 }
  0x56   : > { %321 = vmatmul.mubr.f32.vlgmr.msra.gmra.mxu0 %v1566_v36 }
  0x57   : > { %325 = vmatprep.mubr.f32.mxu0 %v1569_v37 }
  0x5a   : > { %326 = vmatmul.mubr.f32.gmra.mxu0 %v1574_v38 }
  0x5b   : > { %330 = vmatprep.mubr.f32.mxu0 %v1577_v39 }
  0x5e   : > { %331 = vmatmul.mubr.f32.gmra.mxu0 %v1582_v40 }
  0x5f   : > { %335 = vmatprep.mubr.f32.mxu0 %v1585_v41 }
  0x62   : > { %336 = vmatmul.mubr.f32.gmra.mxu0 %v1590_v42 }
  0x63   : > { %340 = vmatprep.mubr.f32.mxu0 %v1593_v43 }
  0x66   : > { %341 = vmatmul.mubr.f32.gmra.mxu0 %v1598_v44 }
  0x67   : > { %345 = vmatprep.mubr.f32.mxu0 %v1601_v45 }
  0x6a   : > { %346 = vmatmul.mubr.f32.gmra.mxu0 %v1606_v46 }
  0x6b   : > { %350 = vmatprep.mubr.f32.mxu0 %v1609_v47 }
  0x6e   : > { %351 = vmatmul.mubr.f32.gmra.mxu0 %v1614_v48 }
  0x6f   : > { %355 = vmatprep.mubr.f32.mxu0 %v1617_v49 }
  0x72   : > { %356 = vmatmul.mubr.f32.gmra.mxu0 %v1622_v50 }
  0x73   : > { %360 = vmatprep.mubr.f32.mxu0 %v1625_v51 }
  0x76   : > { %361 = vmatmul.mubr.f32.gmra.mxu0 %v1630_v52 }
  0x77   : > { %365 = vmatprep.mubr.f32.mxu0 %v1633_v53 }
  0x7a   : > { %366 = vmatmul.mubr.f32.gmra.mxu0 %v1638_v54 }
  0x7b   : > { %370 = vmatprep.mubr.f32.mxu0 %v1641_v55 }
  0x7e   : > { %371 = vmatmul.mubr.f32.gmra.mxu0 %v1646_v56 }
  0x7f   : > { %375 = vmatprep.mubr.f32.mxu0 %v1649_v57 }
  0x82   : > { %376 = vmatmul.mubr.f32.gmra.mxu0 %v1654_v58 }
  0x83   : > { %380 = vmatprep.mubr.f32.mxu0 %v1657_v59 }
  0x86   : > { %381 = vmatmul.mubr.f32.gmra.mxu0 %v1662_v60 }
  0x87   : > { %385 = vmatprep.mubr.f32.mxu0 %v1665_v61 }
  0x8a   : > { %386 = vmatmul.mubr.f32.gmra.mxu0 %v1670_v62 }
  0x8b   : > { %390 = vmatprep.mubr.f32.mxu0 %v1673_v63 }
  0x8e   : > { %391 = vmatmul.mubr.f32.gmra.mxu0 %v1678_v0 }
  0x8f   : > { %395 = vmatprep.mubr.f32.mxu0 %v1681_v1 }
  0x92   : > { %396 = vmatmul.mubr.f32.gmra.mxu0 %v1686_v2 }
 0x116   : > { %v999_v9 = vpop.f32.mrf.mxu0 }
 0x118   : > { %v1000_v10 = vpop.f32.mrf.mxu0 }
 0x119   : > { %v1001_v11 = vadd.f32 %v1000_v10, %v999_v9 }
 0x11a   : > { %v1002_v12 = vpop.f32.mrf.mxu0 }
 0x11b   : > { %941 = vmatmul.mubr.msk.f32.vlgmr.msra.gmra.mxu1 %vm409_vm0, %v1001_v11 }
 0x11c   : > { %v1003_v14 = vpop.f32.mrf.mxu0  ;;  %528 = vmatprep.mubr.f32.mxu1 %v1323_v8 }
 0x11d   : > { %v1004_v15 = vadd.f32 %v1003_v14, %v1002_v12 }
 0x11e   : > { %v1005_v16 = vpop.f32.mrf.mxu0 }
 0x11f   : > { %942 = vmatmul.mubr.msk.f32.gmra.mxu1 %vm409_vm0, %v1004_v15 }
 0x120   : > { %v1006_v17 = vpop.f32.mrf.mxu0  ;;  %534 = vmatprep.mubr.f32.mxu1 %v1323_v8 }
 0x121   : > { %v1007_v18 = vadd.f32 %v1006_v17, %v1005_v16 }
 0x122   : > { %v1008_v19 = vpop.f32.mrf.mxu0 }
 0x123   : > { %943 = vmatmul.mubr.msk.f32.gmra.mxu1 %vm409_vm0, %v1007_v18 }
 0x124   : > { %v1009_v20 = vpop.f32.mrf.mxu0  ;;  %540 = vmatprep.mubr.f32.mxu1 %v1323_v8 }
 0x125   : > { %v1010_v21 = vadd.f32 %v1009_v20, %v1008_v19 }
 0x126   : > { %v1011_v22 = vpop.f32.mrf.mxu0 }
 0x127   : > { %944 = vmatmul.mubr.msk.f32.gmra.mxu1 %vm409_vm0, %v1010_v21 }
 0x128   : > { %v1012_v23 = vpop.f32.mrf.mxu0  ;;  %546 = vmatprep.mubr.f32.mxu1 %v1323_v8 }
 0x129   : > { %v1013_v24 = vadd.f32 %v1012_v23, %v1011_v22 }
 0x12a   : > { %v1014_v25 = vpop.f32.mrf.mxu0 }
 0x12b   : > { %945 = vmatmul.mubr.msk.f32.gmra.mxu1 %vm409_vm0, %v1013_v24 }
 0x12c   : > { %v1015_v26 = vpop.f32.mrf.mxu0  ;;  %552 = vmatprep.mubr.f32.mxu1 %v1323_v8 }
 0x12d   : > { %v1016_v27 = vadd.f32 %v1015_v26, %v1014_v25 }
 0x12e   : > { %v1017_v28 = vpop.f32.mrf.mxu0 }
 0x12f   : > { %946 = vmatmul.mubr.msk.f32.gmra.mxu1 %vm409_vm0, %v1016_v27 }
 0x130   : > { %v1018_v29 = vpop.f32.mrf.mxu0  ;;  %558 = vmatprep.mubr.f32.mxu1 %v1323_v8 }
 0x131   : > { %v1019_v30 = vadd.f32 %v1018_v29, %v1017_v28 }
 0x132   : > { %v1020_v31 = vpop.f32.mrf.mxu0 }
 0x133   : > { %947 = vmatmul.mubr.msk.f32.gmra.mxu1 %vm409_vm0, %v1019_v30 }
 0x134   : > { %v1021_v32 = vpop.f32.mrf.mxu0  ;;  %564 = vmatprep.mubr.f32.mxu1 %v1323_v8 }
 0x135   : > { %v1022_v33 = vadd.f32 %v1021_v32, %v1020_v31 }
 0x136   : > { %v1023_v34 = vpop.f32.mrf.mxu0 }
 0x137   : > { %948 = vmatmul.mubr.msk.f32.gmra.mxu1 %vm409_vm0, %v1022_v33 }
 0x138   : > { %v1024_v35 = vpop.f32.mrf.mxu0  ;;  %570 = vmatprep.mubr.f32.mxu1 %v1323_v8 }
 0x139   : > { %v1025_v3 = vadd.f32 %v1024_v35, %v1023_v34 }
 0x13a   : > { %v1026_v4 = vpop.f32.mrf.mxu0 }
 0x13b   : > { %949 = vmatmul.mubr.msk.f32.gmra.mxu1 %vm409_vm0, %v1025_v3 }
 0x13c   : > { %v1027_v5 = vpop.f32.mrf.mxu0  ;;  %576 = vmatprep.mubr.f32.mxu1 %v1323_v8 }
 0x13d   : > { %v1028_v6 = vadd.f32 %v1027_v5, %v1026_v4 }
 0x13e   : > { %v1029_v7 = vpop.f32.mrf.mxu0 }
 0x13f   : > { %950 = vmatmul.mubr.msk.f32.gmra.mxu1 %vm409_vm0, %v1028_v6 }
 0x140   : > { %v1030_v9 = vpop.f32.mrf.mxu0  ;;  %582 = vmatprep.mubr.f32.mxu1 %v1323_v8 }
 0x141   : > { %v1031_v10 = vadd.f32 %v1030_v9, %v1029_v7 }
 0x142   : > { %v1032_v11 = vpop.f32.mrf.mxu0 }
 0x143   : > { %951 = vmatmul.mubr.msk.f32.gmra.mxu1 %vm409_vm0, %v1031_v10 }
 0x144   : > { %v1033_v12 = vpop.f32.mrf.mxu0  ;;  %588 = vmatprep.mubr.f32.mxu1 %v1323_v8 }
 0x145   : > { %v1034_v14 = vadd.f32 %v1033_v12, %v1032_v11 }
 0x146   : > { %v1035_v15 = vpop.f32.mrf.mxu0 }
 0x147   : > { %952 = vmatmul.mubr.msk.f32.gmra.mxu1 %vm409_vm0, %v1034_v14 }
 0x148   : > { %v1036_v16 = vpop.f32.mrf.mxu0  ;;  %594 = vmatprep.mubr.f32.mxu1 %v1323_v8 }
 0x149   : > { %v1037_v17 = vadd.f32 %v1036_v16, %v1035_v15 }
 0x14a   : > { %v1038_v18 = vpop.f32.mrf.mxu0 }
 0x14b   : > { %953 = vmatmul.mubr.msk.f32.gmra.mxu1 %vm409_vm0, %v1037_v17 }
 0x14c   : > { %v1039_v19 = vpop.f32.mrf.mxu0  ;;  %600 = vmatprep.mubr.f32.mxu1 %v1323_v8 }
 0x14d   : > { %v1040_v20 = vadd.f32 %v1039_v19, %v1038_v18 }
 0x14e   : > { %v1041_v21 = vpop.f32.mrf.mxu0 }
 0x14f   : > { %954 = vmatmul.mubr.msk.f32.gmra.mxu1 %vm409_vm0, %v1040_v20 }
 0x150   : > { %v1042_v22 = vpop.f32.mrf.mxu0  ;;  %606 = vmatprep.mubr.f32.mxu1 %v1323_v8 }
 0x151   : > { %v1043_v23 = vadd.f32 %v1042_v22, %v1041_v21 }
 0x152   : > { %v1044_v24 = vpop.f32.mrf.mxu0 }
 0x153   : > { %955 = vmatmul.mubr.msk.f32.gmra.mxu1 %vm409_vm0, %v1043_v23 }
 0x154   : > { %v1045_v25 = vpop.f32.mrf.mxu0  ;;  %612 = vmatprep.mubr.f32.mxu1 %v1323_v8 }
 0x155   : > { %v1046_v26 = vadd.f32 %v1045_v25, %v1044_v24 }
 0x157   : > { %956 = vmatmul.mubr.msk.f32.gmra.mxu1 %vm409_vm0, %v1046_v26 }
 0x1db   : > { %v524_v27 = vpop.f32.mrf.mxu1 }
 0x1dc   : > { %v619_v28 = vsub.f32 0.0, %v524_v27 }
 0x1dd   : > { %v526_v29 = vpop.f32.mrf.mxu1 }
 0x1de   : > { %v651_v30 = vmul.f32 1.442695, %v619_v28  ;;  %v620_v31 = vsub.f32 0.0, %v526_v29 }
 0x1df   : > { %v530_v32 = vpop.f32.mrf.mxu1 }
 0x1e0   : > { %1098 = vpow2.f32 %v651_v30  ;;  %v653_v33 = vmul.f32 1.442695, %v620_v31  ;;  %v621_v34 = vsub.f32 0.0, %v530_v32 }
 0x1e1   : > { %v532_v35 = vpop.f32.mrf.mxu1 }
 0x1e2   : > { %1100 = vpow2.f32 %v653_v33  ;;  %v655_v3 = vmul.f32 1.442695, %v621_v34  ;;  %v622_v4 = vsub.f32 0.0, %v532_v35 }
 0x1e3   : > { %v536_v5 = vpop.f32.mrf.mxu1 }
 0x1e4   : > { %1102 = vpow2.f32 %v655_v3  ;;  %v657_v6 = vmul.f32 1.442695, %v622_v4  ;;  %v623_v8 = vsub.f32 0.0, %v536_v5 }
 0x1e5   : > { %v538_v7 = vpop.f32.mrf.mxu1 }
 0x1e6   : > { %1104 = vpow2.f32 %v657_v6  ;;  %v659_v9 = vmul.f32 1.442695, %v623_v8  ;;  %v624_v10 = vsub.f32 0.0, %v538_v7 }
 0x1e7   : > { %v542_v11 = vpop.f32.mrf.mxu1 }
 0x1e8   : > { %1106 = vpow2.f32 %v659_v9  ;;  %v661_v12 = vmul.f32 1.442695, %v624_v10  ;;  %v625_v14 = vsub.f32 0.0, %v542_v11 }
 0x1e9   : > { %v544_v15 = vpop.f32.mrf.mxu1 }
 0x1ea   : > { %1108 = vpow2.f32 %v661_v12  ;;  %v663_v16 = vmul.f32 1.442695, %v625_v14  ;;  %v626_v17 = vsub.f32 0.0, %v544_v15 }
 0x1eb   : > { %v548_v18 = vpop.f32.mrf.mxu1 }
 0x1ec   : > { %1110 = vpow2.f32 %v663_v16  ;;  %v665_v19 = vmul.f32 1.442695, %v626_v17  ;;  %v627_v20 = vsub.f32 0.0, %v548_v18 }
 0x1ed   : > { %v1099_v21 = vpop.eup %1098  ;;  %v550_v22 = vpop.f32.mrf.mxu1 }
 0x1ee   : > { %v715_v23 = vadd.f32 1.0, %v1099_v21  ;;  %1112 = vpow2.f32 %v665_v19  ;;  %v667_v24 = vmul.f32 1.442695, %v627_v20  ;;  %v628_v25 = vsub.f32 0.0, %v550_v22 }
 0x1ef   : > { %v1101_v26 = vpop.eup %1100  ;;  %v554_v27 = vpop.f32.mrf.mxu1 }
 0x1f0   : > { %1114 = vrcp.f32 %v715_v23  ;;  %v716_v28 = vadd.f32 1.0, %v1101_v26  ;;  %v669_v29 = vmul.f32 1.442695, %v628_v25  ;;  %v629_v30 = vsub.f32 0.0, %v554_v27 }
 0x1f1   : > { %v1103_v31 = vpop.eup %1102  ;;  %1116 = vpow2.f32 %v667_v24  ;;  %v556_v32 = vpop.f32.mrf.mxu1 }
 0x1f2   : > { %1118 = vrcp.f32 %v716_v28  ;;  %v717_v33 = vadd.f32 1.0, %v1103_v31  ;;  %v671_v34 = vmul.f32 1.442695, %v629_v30  ;;  %v630_v35 = vsub.f32 0.0, %v556_v32 }
 0x1f3   : > { %v1105_v3 = vpop.eup %1104  ;;  %1120 = vpow2.f32 %v669_v29  ;;  %v560_v4 = vpop.f32.mrf.mxu1 }
 0x1f4   : > { %1122 = vrcp.f32 %v717_v33  ;;  %v718_v5 = vadd.f32 1.0, %v1105_v3  ;;  %v673_v6 = vmul.f32 1.442695, %v630_v35  ;;  %v631_v8 = vsub.f32 0.0, %v560_v4 }
 0x1f5   : > { %v1107_v7 = vpop.eup %1106  ;;  %1124 = vpow2.f32 %v671_v34  ;;  %v562_v9 = vpop.f32.mrf.mxu1 }
 0x1f6   : > { %1126 = vrcp.f32 %v718_v5  ;;  %v719_v10 = vadd.f32 1.0, %v1107_v7  ;;  %v675_v11 = vmul.f32 1.442695, %v631_v8  ;;  %v632_v12 = vsub.f32 0.0, %v562_v9 }
 0x1f7   : > { %v1109_v14 = vpop.eup %1108  ;;  %1128 = vpow2.f32 %v673_v6  ;;  %v566_v15 = vpop.f32.mrf.mxu1 }
 0x1f8   : > { %1130 = vrcp.f32 %v719_v10  ;;  %v720_v16 = vadd.f32 1.0, %v1109_v14  ;;  %v677_v17 = vmul.f32 1.442695, %v632_v12  ;;  %v633_v18 = vsub.f32 0.0, %v566_v15 }
 0x1f9   : > { %v1111_v19 = vpop.eup %1110  ;;  %1132 = vpow2.f32 %v675_v11  ;;  %v568_v20 = vpop.f32.mrf.mxu1 }
 0x1fa   : > { %1134 = vrcp.f32 %v720_v16  ;;  %v721_v21 = vadd.f32 1.0, %v1111_v19  ;;  %v679_v22 = vmul.f32 1.442695, %v633_v18  ;;  %v634_v23 = vsub.f32 0.0, %v568_v20 }
 0x1fb   : > { %v1113_v24 = vpop.eup %1112  ;;  %1136 = vpow2.f32 %v677_v17  ;;  %v572_v25 = vpop.f32.mrf.mxu1 }
 0x1fc   : > { %1138 = vrcp.f32 %v721_v21  ;;  %v722_v26 = vadd.f32 1.0, %v1113_v24  ;;  %v681_v27 = vmul.f32 1.442695, %v634_v23  ;;  %v635_v28 = vsub.f32 0.0, %v572_v25 }
 0x1fd   : > { %v1115_v29 = vpop.eup %1114  ;;  %1140 = vpow2.f32 %v679_v22  ;;  %v574_v30 = vpop.f32.mrf.mxu1 }
 0x1fe   : > { %v1117_v31 = vpop.eup %1116  ;;  %v779_v32 = vmul.f32 %v1115_v29, %v1566_v36  ;;  %1142 = vrcp.f32 %v722_v26  ;;  %v683_v33 = vmul.f32 1.442695, %v635_v28  ;;  %v636_v34 = vsub.f32 0.0, %v574_v30 }
 0x1ff   : > { %v1119_v35 = vpop.eup %1118  ;;  %v723_v3 = vadd.f32 1.0, %v1117_v31  ;;  %1144 = vpow2.f32 %v681_v27  ;;  %v578_v4 = vpop.f32.mrf.mxu1 }
 0x200   : > { %v1121_v5 = vpop.eup %1120  ;;  %811 = vst [vmem:[%s1739_s17] sm:$0xff] %v779_v32  ;;  %v780_v6 = vmul.f32 %v1119_v35, %v1496_v13  ;;  %1146 = vpow2.f32 %v683_v33  ;;  %v685_v8 = vmul.f32 1.442695, %v636_v34  ;;  %v637_v7 = vsub.f32 0.0, %v578_v4 }
 0x201   : > { %v1123_v36 = vpop.eup %1122  ;;  %1148 = vrcp.f32 %v723_v3  ;;  %v724_v9 = vadd.f32 1.0, %v1121_v5  ;;  %v580_v10 = vpop.f32.mrf.mxu1 }
 0x202   : > { %v1125_v11 = vpop.eup %1124  ;;  %812 = vst [vmem:[%s1739_s17 + $0x8] sm:$0xff] %v780_v6  ;;  %v781_v12 = vmul.f32 %v1123_v36, %v1574_v38  ;;  %1150 = vpow2.f32 %v685_v8  ;;  %v687_v14 = vmul.f32 1.442695, %v637_v7  ;;  %v638_v15 = vsub.f32 0.0, %v580_v10 }
 0x203   : > { %v1127_v16 = vpop.eup %1126  ;;  %1152 = vrcp.f32 %v724_v9  ;;  %v725_v17 = vadd.f32 1.0, %v1125_v11  ;;  %v584_v13 = vpop.f32.mrf.mxu1 }
 0x204   : > { %v1129_v18 = vpop.eup %1128  ;;  %813 = vst [vmem:[%s1739_s17 + $0x10] sm:$0xff] %v781_v12  ;;  %v782_v19 = vmul.f32 %v1127_v16, %v1569_v37  ;;  %1154 = vpow2.f32 %v687_v14  ;;  %v689_v20 = vmul.f32 1.442695, %v638_v15  ;;  %v639_v21 = vsub.f32 0.0, %v584_v13 }
 0x205   : > { %v1131_v22 = vpop.eup %1130  ;;  %1156 = vrcp.f32 %v725_v17  ;;  %v726_v23 = vadd.f32 1.0, %v1129_v18  ;;  %v586_v38 = vpop.f32.mrf.mxu1 }
 0x206   : > { %v1133_v24 = vpop.eup %1132  ;;  %814 = vst [vmem:[%s1739_s17 + $0x18] sm:$0xff] %v782_v19  ;;  %v783_v25 = vmul.f32 %v1131_v22, %v1582_v40  ;;  %1158 = vpow2.f32 %v689_v20  ;;  %v691_v26 = vmul.f32 1.442695, %v639_v21  ;;  %v640_v27 = vsub.f32 0.0, %v586_v38 }
 0x207   : > { %v1135_v28 = vpop.eup %1134  ;;  %1160 = vrcp.f32 %v726_v23  ;;  %v727_v29 = vadd.f32 1.0, %v1133_v24  ;;  %v590_v37 = vpop.f32.mrf.mxu1 }
 0x208   : > { %v1137_v30 = vpop.eup %1136  ;;  %815 = vst [vmem:[%s1739_s17 + $0x20] sm:$0xff] %v783_v25  ;;  %v784_v31 = vmul.f32 %v1135_v28, %v1577_v39  ;;  %1162 = vpow2.f32 %v691_v26  ;;  %v693_v32 = vmul.f32 1.442695, %v640_v27  ;;  %v641_v33 = vsub.f32 0.0, %v590_v37 }
 0x209   : > { %v1139_v34 = vpop.eup %1138  ;;  %1164 = vrcp.f32 %v727_v29  ;;  %v728_v35 = vadd.f32 1.0, %v1137_v30  ;;  %v592_v40 = vpop.f32.mrf.mxu1 }
 0x20a   : > { %v1141_v3 = vpop.eup %1140  ;;  %816 = vst [vmem:[%s1739_s17 + $0x28] sm:$0xff] %v784_v31  ;;  %v785_v4 = vmul.f32 %v1139_v34, %v1590_v42  ;;  %1166 = vpow2.f32 %v693_v32  ;;  %v695_v5 = vmul.f32 1.442695, %v641_v33  ;;  %v642_v6 = vsub.f32 0.0, %v592_v40 }
 0x20b   : > { %v1143_v8 = vpop.eup %1142  ;;  %1168 = vrcp.f32 %v728_v35  ;;  %v729_v7 = vadd.f32 1.0, %v1141_v3  ;;  %v596_v39 = vpop.f32.mrf.mxu1 }
 0x20c   : > { %v1145_v36 = vpop.eup %1144  ;;  %817 = vst [vmem:[%s1739_s17 + $0x30] sm:$0xff] %v785_v4  ;;  %v786_v9 = vmul.f32 %v1143_v8, %v1585_v41  ;;  %1170 = vpow2.f32 %v695_v5  ;;  %v697_v10 = vmul.f32 1.442695, %v642_v6  ;;  %v643_v11 = vsub.f32 0.0, %v596_v39 }
 0x20d   : > { %v1147_v12 = vpop.eup %1146  ;;  %1172 = vrcp.f32 %v729_v7  ;;  %v730_v14 = vadd.f32 1.0, %v1145_v36  ;;  %v598_v15 = vpop.f32.mrf.mxu1 }
 0x20e   : > { %v1149_v42 = vpop.eup %1148  ;;  %818 = vst [vmem:[%s1739_s17 + $0x38] sm:$0xff] %v786_v9  ;;  %v731_v16 = vadd.f32 1.0, %v1147_v12  ;;  %1174 = vpow2.f32 %v697_v10  ;;  %v699_v17 = vmul.f32 1.442695, %v643_v11  ;;  %v644_v13 = vsub.f32 0.0, %v598_v15 }
 0x20f   : > { %v1151_v18 = vpop.eup %1150  ;;  %v787_v19 = vmul.f32 %v1149_v42, %v1598_v44  ;;  %1176 = vrcp.f32 %v730_v14  ;;  %v602_v20 = vpop.f32.mrf.mxu1 }
 0x210   : > { %v1153_v41 = vpop.eup %1152  ;;  %1178 = vrcp.f32 %v731_v16  ;;  %v732_v21 = vadd.f32 1.0, %v1151_v18  ;;  %v701_v22 = vmul.f32 1.442695, %v644_v13  ;;  %v645_v23 = vsub.f32 0.0, %v602_v20 }
 0x211   : > { %v1155_v38 = vpop.eup %1154  ;;  %819 = vst [vmem:[%s1739_s17 + $0x40] sm:$0xff] %v787_v19  ;;  %v788_v24 = vmul.f32 %v1153_v41, %v1593_v43  ;;  %1180 = vpow2.f32 %v699_v17  ;;  %v604_v25 = vpop.f32.mrf.mxu1 }
 0x212   : > { %v1157_v26 = vpop.eup %1156  ;;  %1182 = vrcp.f32 %v732_v21  ;;  %v733_v27 = vadd.f32 1.0, %v1155_v38  ;;  %v703_v28 = vmul.f32 1.442695, %v645_v23  ;;  %v646_v44 = vsub.f32 0.0, %v604_v25 }
 0x213   : > { %v1159_v29 = vpop.eup %1158  ;;  %820 = vst [vmem:[%s1739_s17 + $0x48] sm:$0xff] %v788_v24  ;;  %v789_v37 = vmul.f32 %v1157_v26, %v1606_v46  ;;  %1184 = vpow2.f32 %v701_v22  ;;  %v608_v30 = vpop.f32.mrf.mxu1 }
 0x214   : > { %v1161_v31 = vpop.eup %1160  ;;  %1186 = vrcp.f32 %v733_v27  ;;  %v734_v32 = vadd.f32 1.0, %v1159_v29  ;;  %v705_v33 = vmul.f32 1.442695, %v646_v44  ;;  %v647_v43 = vsub.f32 0.0, %v608_v30 }
 0x215   : > { %v1163_v34 = vpop.eup %1162  ;;  %821 = vst [vmem:[%s1739_s17 + $0x50] sm:$0xff] %v789_v37  ;;  %v790_v35 = vmul.f32 %v1161_v31, %v1601_v45  ;;  %1188 = vpow2.f32 %v703_v28  ;;  %v610_v40 = vpop.f32.mrf.mxu1 }
 0x216   : > { %v1165_v3 = vpop.eup %1164  ;;  %1190 = vrcp.f32 %v734_v32  ;;  %v735_v4 = vadd.f32 1.0, %v1163_v34  ;;  %v707_v5 = vmul.f32 1.442695, %v647_v43  ;;  %v648_v46 = vsub.f32 0.0, %v610_v40 }
 0x217   : > { %v1167_v6 = vpop.eup %1166  ;;  %822 = vst [vmem:[%s1739_s17 + $0x58] sm:$0xff] %v790_v35  ;;  %v791_v8 = vmul.f32 %v1165_v3, %v1614_v48  ;;  %1192 = vpow2.f32 %v705_v33  ;;  %v614_v7 = vpop.f32.mrf.mxu1 }
 0x218   : > { %v1169_v39 = vpop.eup %1168  ;;  %1194 = vrcp.f32 %v735_v4  ;;  %v736_v36 = vadd.f32 1.0, %v1167_v6  ;;  %v709_v9 = vmul.f32 1.442695, %v648_v46  ;;  %v649_v45 = vsub.f32 0.0, %v614_v7 }
 0x219   : > { %v1171_v10 = vpop.eup %1170  ;;  %823 = vst [vmem:[%s1739_s17 + $0x60] sm:$0xff] %v791_v8  ;;  %v792_v11 = vmul.f32 %v1169_v39, %v1609_v47  ;;  %1196 = vpow2.f32 %v707_v5  ;;  %v616_v12 = vpop.f32.mrf.mxu1 }
 0x21a   : > { %v1173_v14 = vpop.eup %1172  ;;  %1198 = vrcp.f32 %v736_v36  ;;  %v737_v15 = vadd.f32 1.0, %v1171_v10  ;;  %v711_v42 = vmul.f32 1.442695, %v649_v45  ;;  %v650_v48 = vsub.f32 0.0, %v616_v12 }
 0x21b   : > { %v1175_v16 = vpop.eup %1174  ;;  %824 = vst [vmem:[%s1739_s17 + $0x68] sm:$0xff] %v792_v11  ;;  %v793_v17 = vmul.f32 %v1173_v14, %v1622_v50  ;;  %1200 = vpow2.f32 %v709_v9 }
 0x21c   : > { %v1177_v13 = vpop.eup %1176  ;;  %1202 = vrcp.f32 %v737_v15  ;;  %v738_v18 = vadd.f32 1.0, %v1175_v16  ;;  %v713_v19 = vmul.f32 1.442695, %v650_v48 }
 0x21d   : > { %v1179_v47 = vpop.eup %1178  ;;  %825 = vst [vmem:[%s1739_s17 + $0x70] sm:$0xff] %v793_v17  ;;  %v794_v20 = vmul.f32 %v1177_v13, %v1617_v49  ;;  %1204 = vpow2.f32 %v711_v42 }
 0x21e   : > { %v1181_v41 = vpop.eup %1180  ;;  %v795_v21 = vmul.f32 %v1179_v47, %v1630_v52  ;;  %1206 = vrcp.f32 %v738_v18 }
 0x21f   : > { %v1183_v22 = vpop.eup %1182  ;;  %826 = vst [vmem:[%s1739_s17 + $0x78] sm:$0xff] %v794_v20  ;;  %v739_v50 = vadd.f32 1.0, %v1181_v41  ;;  %1208 = vpow2.f32 %v713_v19 }
 0x220   : > { %v1185_v23 = vpop.eup %1184  ;;  %827 = vst [vmem:[%s1739_s17 + $0x80] sm:$0xff] %v795_v21  ;;  %v796_v38 = vmul.f32 %v1183_v22, %v1625_v51 }
 0x221   : > { %v1187_v24 = vpop.eup %1186  ;;  %1210 = vrcp.f32 %v739_v50  ;;  %v740_v25 = vadd.f32 1.0, %v1185_v23 }
 0x222   : > { %v1189_v49 = vpop.eup %1188  ;;  %828 = vst [vmem:[%s1739_s17 + $0x88] sm:$0xff] %v796_v38  ;;  %v797_v26 = vmul.f32 %v1187_v24, %v1638_v54 }
 0x223   : > { %v1191_v27 = vpop.eup %1190  ;;  %1212 = vrcp.f32 %v740_v25  ;;  %v741_v52 = vadd.f32 1.0, %v1189_v49 }
 0x224   : > { %v1193_v28 = vpop.eup %1192  ;;  %829 = vst [vmem:[%s1739_s17 + $0x90] sm:$0xff] %v797_v26  ;;  %v798_v44 = vmul.f32 %v1191_v27, %v1633_v53 }
 0x225   : > { %v1195_v29 = vpop.eup %1194  ;;  %1214 = vrcp.f32 %v741_v52  ;;  %v742_v51 = vadd.f32 1.0, %v1193_v28 }
 0x226   : > { %v1197_v37 = vpop.eup %1196  ;;  %830 = vst [vmem:[%s1739_s17 + $0x98] sm:$0xff] %v798_v44  ;;  %v799_v30 = vmul.f32 %v1195_v29, %v1646_v56 }
 0x227   : > { %v1199_v31 = vpop.eup %1198  ;;  %1216 = vrcp.f32 %v742_v51  ;;  %v743_v54 = vadd.f32 1.0, %v1197_v37 }
 0x228   : > { %v1201_v32 = vpop.eup %1200  ;;  %831 = vst [vmem:[%s1739_s17 + $0xa0] sm:$0xff] %v799_v30  ;;  %v800_v33 = vmul.f32 %v1199_v31, %v1641_v55 }
 0x229   : > { %v1203_v43 = vpop.eup %1202  ;;  %1218 = vrcp.f32 %v743_v54  ;;  %v744_v53 = vadd.f32 1.0, %v1201_v32 }
 0x22a   : > { %v1205_v34 = vpop.eup %1204  ;;  %832 = vst [vmem:[%s1739_s17 + $0xa8] sm:$0xff] %v800_v33  ;;  %v801_v35 = vmul.f32 %v1203_v43, %v1654_v58 }
 0x22b   : > { %v1207_v40 = vpop.eup %1206  ;;  %1220 = vrcp.f32 %v744_v53  ;;  %v745_v56 = vadd.f32 1.0, %v1205_v34 }
 0x22c   : > { %v1209_v3 = vpop.eup %1208  ;;  %833 = vst [vmem:[%s1739_s17 + $0xb0] sm:$0xff] %v801_v35  ;;  %v802_v4 = vmul.f32 %v1207_v40, %v1649_v57 }
 0x22d   : > { %1222 = vrcp.f32 %v745_v56  ;;  %v746_v55 = vadd.f32 1.0, %v1209_v3 }
 0x22e   : > { %v1211_v5 = vpop.eup %1210  ;;  %834 = vst [vmem:[%s1739_s17 + $0xb8] sm:$0xff] %v802_v4 }
 0x22f   : > { %v803_v46 = vmul.f32 %v1211_v5, %v1662_v60  ;;  %1224 = vrcp.f32 %v746_v55 }
 0x230   : > { %v1213_v58 = vpop.eup %1212 }
 0x231   : > { %835 = vst [vmem:[%s1739_s17 + $0xc0] sm:$0xff] %v803_v46  ;;  %v804_v6 = vmul.f32 %v1213_v58, %v1657_v59 }
 0x232   : > { %v1215_v8 = vpop.eup %1214 }
 0x233   : > { %836 = vst [vmem:[%s1739_s17 + $0xc8] sm:$0xff] %v804_v6  ;;  %v805_v57 = vmul.f32 %v1215_v8, %v1670_v62 }
 0x234   : > { %v1217_v7 = vpop.eup %1216 }
 0x235   : > { %837 = vst [vmem:[%s1739_s17 + $0xd0] sm:$0xff] %v805_v57  ;;  %v806_v39 = vmul.f32 %v1217_v7, %v1665_v61 }
 0x236   : > { %v1219_v36 = vpop.eup %1218 }
 0x237   : > { %838 = vst [vmem:[%s1739_s17 + $0xd8] sm:$0xff] %v806_v39  ;;  %v807_v60 = vmul.f32 %v1219_v36, %v1678_v0 }
 0x238   : > { %v1221_v9 = vpop.eup %1220 }
 0x239   : > { %839 = vst [vmem:[%s1739_s17 + $0xe0] sm:$0xff] %v807_v60  ;;  %v808_v59 = vmul.f32 %v1221_v9, %v1673_v63 }
 0x23a   : > { %v1223_v45 = vpop.eup %1222 }
 0x23b   : > { %840 = vst [vmem:[%s1739_s17 + $0xe8] sm:$0xff] %v808_v59  ;;  %v809_v62 = vmul.f32 %v1223_v45, %v1686_v2 }
 0x23c   : > { %v1225_v10 = vpop.eup %1224 }
 0x23d   : > { %841 = vst [vmem:[%s1739_s17 + $0xf0] sm:$0xff] %v809_v62  ;;  %v810_v61 = vmul.f32 %v1225_v10, %v1681_v1 }
 0x23f   : > { %842 = vst [vmem:[%s1739_s17 + $0xf8] sm:$0xff] %v810_v61 }
 0x240   : > { %1267 = shalt.err (!%p1264_p10)
}
 0x241   : > { %s1268_s30 = scalar_lea.hbm %s1806_s23, 4096  ;;  %s1272_s6 = scalar_lea.hbm %s1857_s3, 8192 }
 0x242   : > { %p1269_p0 = scmp.ne.s32.totalorder %s1806_s23, %s1268_s30  ;;  %p1273_p1 = scmp.lt.s32.totalorder %s1806_s23, %s1857_s3 }
 0x243   : > { %p1274_p3 = scmp.lt.s32.totalorder %s1272_s6, %s1268_s30 }
 0x244   : > { %p1270_p2 = pnand %p1269_p0, %p1866_p12 }
 0x245   : > { %p1275_p6 = por %p1274_p3, %p1273_p1 }
 0x246   : > { %p1271_p9 = pneg %p1270_p2 }
 0x248   : > { %p1276_p11 = pnand %p1275_p6, %p1271_p9 }
 0x24a   : > { %1279 = shalt.err (!%p1276_p11)
}
 0x24b   : > { %s1325_s8 = smov 256   ;;  %s1326_s17 = smov 16  }
 0x24c   : > { %1049 = dma.vmem_to_hbm [thread:$0]  (%p1866_p12), %s1808_s19, 4096, %s1806_s23, %s844_s16, %s1325_s8, %s1325_s8, %s1326_s17  }
 0x24d PF: > { %s873_s9 = sand.u32 1, %s1306_s12   ;;  %p1867_p13 = scmp.ne.s32.totalorder %s1863_s25, 0 }
 0x24e   : > { %p1868_p4 = scmp.ge.s32.totalorder %s1318_s15, 2  ;;  %s874_s20 = scalar_lea.sflag [#allocation4], %s873_s9 }
 0x250   : > { %p1056_p5 = pnand %p1868_p4, %p1867_p13 }
 0x252   : > { %p1057_p7 = pneg %p1056_p5 }
 0x254   : > { %1301 = dma.done.wait (%p1057_p7), %s874_s20, 4096  }
 0x255   : > { %1303 = vsyncadd (%p1057_p7), %s874_s20, 4294963200  ;;  %p16_p8 = scmp.ge.s32.totalorder %s1372_s18, 4   ;;  %s1869_s12 = smov %s1310_s13 }
 0x256   : > { %s1870_s13 = smov %s1314_s14  ;;  %s1871_s14 = smov %s1384_s21 }
 0x257   : > { %s1872_s15 = smov %s1372_s18  ;;  %18 = sbr.rel (!%p16_p8) target bundleno = 5 (0x5), region = 77 }
 0x25c   :  { %879 = vsyncpa [#allocation3], 1 }
 0x25d   :  { %881 = vsyncpa [#allocation3 + $0x1], 1 }
 0x25e   :  { %882 = vsyncpa [#allocation4], 1 }
 0x25f   :  { %884 = vsyncpa [#allocation4 + $0x1], 1 }

</bundles_post_ra>
